<compile_context>
chip_gen: v6e
topology: v6e:2x2x1
jax: 0.10.0
libtpu: 0.0.40
codegen_flags: <defaults>
</compile_context>

<pallas_src>
import functools

import jax
import jax.numpy as jnp
from jax.experimental import pallas as pl
from jax.experimental.pallas import tpu as pltpu

EPS = 1e-5  # InstanceNorm3d default eps


def _conv_block_kernel(DHW, shifts, compute_dtype,
                       mask_ref, x_ref, w1_ref, b1_ref, w2_ref, b2_ref,
                       wr_ref, br_ref, out_ref):
    """One batch sample per grid step. Activations are (channels, D*H*W)."""
    inv_n = 1.0 / DHW
    x = x_ref[0]                                    # (Cp, DHW), lane-dense

    def im2col(a):
        # (Ca, DHW) -> (27*Ca, DHW): tap t is a lane-roll of `a` by the
        # flattened offset, with out-of-volume positions zeroed by the mask
        # (zero-padding semantics). No strided slices, no padded scratch.
        rows = []
        for tap, s in enumerate(shifts):
            if s == 0:                              # center tap: identity, all valid
                rows.append(a)
            else:
                shifted = pltpu.roll(a, (-s) % DHW, axis=1)
                rows.append(shifted * mask_ref[tap:tap + 1, :])
        return jnp.concatenate(rows, axis=0)

    def conv_norm_relu(a, w_ref, b_ref):
        # Single MXU matmul per conv: (C, 27*Cp) @ (27*Cp, DHW), f32 accumulate.
        y = jnp.dot(w_ref[...], im2col(a),
                    preferred_element_type=jnp.float32) + b_ref[...]
        # Fused one-pass InstanceNorm3d stats (biased var) + ReLU, all in f32.
        mean = jnp.sum(y, axis=1, keepdims=True) * inv_n
        var = jnp.sum(y * y, axis=1, keepdims=True) * inv_n - mean * mean
        return jnp.maximum((y - mean) * jax.lax.rsqrt(var + EPS), 0.0)

    y1 = conv_norm_relu(x, w1_ref, b1_ref)                           # (C, DHW)
    y2 = conv_norm_relu(y1.astype(compute_dtype), w2_ref, b2_ref)    # (C, DHW)

    # 1x1x1 residual conv reuses the resident input (center tap), same layout.
    res = jnp.dot(wr_ref[...], x, preferred_element_type=jnp.float32) + br_ref[...]

    out_ref[0] = (y2 + res).astype(out_ref.dtype)                    # full-width store


def conv_block_forward(x_ncdhw, params, *, matmul_dtype=jnp.float32):
    """Matches convBlock.forward for residual=True, pool=None. Returns (out, [])."""
    w1, b1, w2, b2, wr, br = params
    N, Cin, D, H, W = x_ncdhw.shape
    C = w1.shape[0]
    DHW = D * H * W
    Cp = -(-Cin // 8) * 8          # pad input channels up to one sublane tile
    assert C % 8 == 0, "out_chanels must be a multiple of 8 for this layout"
    cdt = jnp.dtype(matmul_dtype)

    # Channel-major flattened activations: pure reshape + tiny channel pad,
    # no NCDHW<->NDHWC transposes anywhere.
    x = x_ncdhw.reshape(N, Cin, DHW)
    if Cp != Cin:
        x = jnp.pad(x, ((0, 0), (0, Cp - Cin), (0, 0)))
    x = x.astype(cdt)

    # Weights -> single im2col slabs (C, 27*Cp); column index = tap*Cp + cin.
    w1_t = jnp.transpose(w1, (0, 2, 3, 4, 1)).reshape(C, 27, Cin)
    w1_t = jnp.pad(w1_t, ((0, 0), (0, 0), (0, Cp - Cin))).reshape(C, 27 * Cp)
    w2_t = jnp.transpose(w2, (0, 2, 3, 4, 1)).reshape(C, 27 * C)
    wr_t = jnp.pad(wr[:, :, 0, 0, 0], ((0, 0), (0, Cp - Cin)))       # (C, Cp)
    b1_t, b2_t, br_t = (jnp.reshape(b, (C, 1)) for b in (b1, b2, br))

    # Border-validity masks + flattened lane shifts for the 27 taps (built once,
    # resident in VMEM across the whole grid).
    p = jnp.arange(DHW)
    d_i, h_i, w_i = p // (H * W), (p // W) % H, p % W
    masks, shifts = [], []
    for dd in (-1, 0, 1):
        for dh in (-1, 0, 1):
            for dw in (-1, 0, 1):
                ok = ((d_i + dd >= 0) & (d_i + dd < D) &
                      (h_i + dh >= 0) & (h_i + dh < H) &
                      (w_i + dw >= 0) & (w_i + dw < W))
                masks.append(ok)
                shifts.append(dd * H * W + dh * W + dw)
    masks = jnp.stack(masks).astype(cdt)             # (27, DHW)

    kernel = functools.partial(_conv_block_kernel, DHW, tuple(shifts), cdt)

    grid_spec = pltpu.PrefetchScalarGridSpec(
        num_scalar_prefetch=0,
        grid=(N,),
        in_specs=[
            pl.BlockSpec((27, DHW), lambda n: (0, 0)),           # tap masks
            pl.BlockSpec((1, Cp, DHW), lambda n: (n, 0, 0)),     # input sample
            pl.BlockSpec((C, 27 * Cp), lambda n: (0, 0)),        # conv1 weights
            pl.BlockSpec((C, 1), lambda n: (0, 0)),              # conv1 bias
            pl.BlockSpec((C, 27 * C), lambda n: (0, 0)),         # conv2 weights
            pl.BlockSpec((C, 1), lambda n: (0, 0)),              # conv2 bias
            pl.BlockSpec((C, Cp), lambda n: (0, 0)),             # residual weights
            pl.BlockSpec((C, 1), lambda n: (0, 0)),              # residual bias
        ],
        out_specs=pl.BlockSpec((1, C, DHW), lambda n: (n, 0, 0)),
    )

    out_flat = pl.pallas_call(
        kernel,
        out_shape=jax.ShapeDtypeStruct((N, C, DHW), jnp.float32),
        grid_spec=grid_spec,
        compiler_params=pltpu.CompilerParams(dimension_semantics=("parallel",)),
    )(masks, x, w1_t.astype(cdt), b1_t, w2_t.astype(cdt), b2_t,
      wr_t.astype(cdt), br_t)

    out = out_flat.reshape(N, C, D, H, W)            # free reshape, already channel-major
    return out, []                                    # pool=None => to_connect == []


def _ref_forward(x, w1, b1, w2, b2, wr, br):
    """Pure-JAX reference (NCDHW), mirrors the PyTorch module exactly."""
    dn = ('NCDHW', 'OIDHW', 'NCDHW')

    def conv(inp, w, b, pad):
        y = jax.lax.conv_general_dilated(inp, w, window_strides=(1, 1, 1),
                                         padding=[(pad, pad)] * 3,
                                         dimension_numbers=dn)
        return y + b[None, :, None, None, None]

    def inorm(y):
        m = jnp.mean(y, axis=(2, 3, 4), keepdims=True)
        v = jnp.mean((y - m) ** 2, axis=(2, 3, 4), keepdims=True)
        return (y - m) * jax.lax.rsqrt(v + EPS)

    h = jnp.maximum(inorm(conv(x, w1, b1, 1)), 0.0)
    h = jnp.maximum(inorm(conv(h, w2, b2, 1)), 0.0)
    return h + conv(x, wr, br, 0)


if __name__ == "__main__":
    N, Cin, C, D, H, W = 2, 4, 8, 8, 8, 8

    key = jax.random.PRNGKey(0)
    kx, k1, k2, k3, k4, k5, k6 = jax.random.split(key, 7)
    x = jax.random.normal(kx, (N, Cin, D, H, W), jnp.float32)
    w1 = jax.random.normal(k1, (C, Cin, 3, 3, 3), jnp.float32) * 0.1
    b1 = jax.random.normal(k2, (C,), jnp.float32) * 0.1
    w2 = jax.random.normal(k3, (C, C, 3, 3, 3), jnp.float32) * 0.1
    b2 = jax.random.normal(k4, (C,), jnp.float32) * 0.1
    wr = jax.random.normal(k5, (C, Cin, 1, 1, 1), jnp.float32) * 0.1
    br = jax.random.normal(k6, (C,), jnp.float32) * 0.1
    params = (w1, b1, w2, b2, wr, br)

    out, to_connect = conv_block_forward(x, params)
    out = jax.block_until_ready(out)

    ref = _ref_forward(x, *params)
    assert out.shape == (N, C, D, H, W)
    assert to_connect == []
    max_err = float(jnp.max(jnp.abs(out - ref)))
    assert jnp.allclose(out, ref, atol=1e-2, rtol=1e-2), f"max_err={max_err}"

    print("KERNEL_OK")
</pallas_src>

<mosaic_0001>
module attributes {stable_mosaic.version = 11 : i64} {
  func.func @_conv_block_kernel(%arg0: i32, %arg1: memref<27x512xf32, #tpu.memory_space<vmem>>, %arg2: memref<1x8x512xf32, #tpu.memory_space<vmem>>, %arg3: memref<8x216xf32, #tpu.memory_space<vmem>>, %arg4: memref<8x1xf32, #tpu.memory_space<vmem>>, %arg5: memref<8x216xf32, #tpu.memory_space<vmem>>, %arg6: memref<8x1xf32, #tpu.memory_space<vmem>>, %arg7: memref<8x8xf32, #tpu.memory_space<vmem>>, %arg8: memref<8x1xf32, #tpu.memory_space<vmem>>, %arg9: memref<1x8x512xf32, #tpu.memory_space<vmem>>) attributes {dimension_semantics = [#tpu.dimension_semantics<parallel>], iteration_bounds = array<i64: 2>, scalar_prefetch = 0 : i64, scratch_operands = 0 : i64, tpu.core_type = #tpu.core_type<tc>, window_params = [{pipeline_mode = #tpu.pipeline_mode<synchronous>, transform_indices = @transform_0, window_bounds = array<i64: 27, 512>}, {transform_indices = @transform_1, window_bounds = array<i64: 1, 8, 512>}, {pipeline_mode = #tpu.pipeline_mode<synchronous>, transform_indices = @transform_2, window_bounds = array<i64: 8, 216>}, {pipeline_mode = #tpu.pipeline_mode<synchronous>, transform_indices = @transform_3, window_bounds = array<i64: 8, 1>}, {pipeline_mode = #tpu.pipeline_mode<synchronous>, transform_indices = @transform_4, window_bounds = array<i64: 8, 216>}, {pipeline_mode = #tpu.pipeline_mode<synchronous>, transform_indices = @transform_5, window_bounds = array<i64: 8, 1>}, {pipeline_mode = #tpu.pipeline_mode<synchronous>, transform_indices = @transform_6, window_bounds = array<i64: 8, 8>}, {pipeline_mode = #tpu.pipeline_mode<synchronous>, transform_indices = @transform_7, window_bounds = array<i64: 8, 1>}, {transform_indices = @transform_8, window_bounds = array<i64: 1, 8, 512>}]} {
    %c0 = arith.constant 0 : index
    %c0_0 = arith.constant 0 : index
    %c0_1 = arith.constant 0 : index
    %0 = vector.load %arg2[%c0, %c0_0, %c0_1] : memref<1x8x512xf32, #tpu.memory_space<vmem>>, vector<1x8x512xf32>
    %1 = vector.shape_cast %0 : vector<1x8x512xf32> to vector<8x512xf32>
    %c0_2 = arith.constant 0 : index
    %c0_3 = arith.constant 0 : index
    %2 = vector.load %arg3[%c0_2, %c0_3] : memref<8x216xf32, #tpu.memory_space<vmem>>, vector<8x216xf32>
    %c73_i32 = arith.constant 73 : i32
    %3 = tpu.dynamic_rotate %1 by %c73_i32 dim 1 : vector<8x512xf32>, i32 -> vector<8x512xf32>
    %c0_4 = arith.constant 0 : index
    %c0_5 = arith.constant 0 : index
    %4 = vector.load %arg1[%c0_4, %c0_5] : memref<27x512xf32, #tpu.memory_space<vmem>>, vector<1x512xf32>
    %5 = vector.broadcast %4 : vector<1x512xf32> to vector<8x512xf32>
    %6 = arith.mulf %3, %5 : vector<8x512xf32>
    %c72_i32 = arith.constant 72 : i32
    %7 = tpu.dynamic_rotate %1 by %c72_i32 dim 1 : vector<8x512xf32>, i32 -> vector<8x512xf32>
    %c1 = arith.constant 1 : index
    %c0_6 = arith.constant 0 : index
    %8 = vector.load %arg1[%c1, %c0_6] : memref<27x512xf32, #tpu.memory_space<vmem>>, vector<1x512xf32>
    %9 = vector.broadcast %8 : vector<1x512xf32> to vector<8x512xf32>
    %10 = arith.mulf %7, %9 : vector<8x512xf32>
    %c71_i32 = arith.constant 71 : i32
    %11 = tpu.dynamic_rotate %1 by %c71_i32 dim 1 : vector<8x512xf32>, i32 -> vector<8x512xf32>
    %c2 = arith.constant 2 : index
    %c0_7 = arith.constant 0 : index
    %12 = vector.load %arg1[%c2, %c0_7] : memref<27x512xf32, #tpu.memory_space<vmem>>, vector<1x512xf32>
    %13 = vector.broadcast %12 : vector<1x512xf32> to vector<8x512xf32>
    %14 = arith.mulf %11, %13 : vector<8x512xf32>
    %c65_i32 = arith.constant 65 : i32
    %15 = tpu.dynamic_rotate %1 by %c65_i32 dim 1 : vector<8x512xf32>, i32 -> vector<8x512xf32>
    %c3 = arith.constant 3 : index
    %c0_8 = arith.constant 0 : index
    %16 = vector.load %arg1[%c3, %c0_8] : memref<27x512xf32, #tpu.memory_space<vmem>>, vector<1x512xf32>
    %17 = vector.broadcast %16 : vector<1x512xf32> to vector<8x512xf32>
    %18 = arith.mulf %15, %17 : vector<8x512xf32>
    %c64_i32 = arith.constant 64 : i32
    %19 = tpu.dynamic_rotate %1 by %c64_i32 dim 1 : vector<8x512xf32>, i32 -> vector<8x512xf32>
    %c4 = arith.constant 4 : index
    %c0_9 = arith.constant 0 : index
    %20 = vector.load %arg1[%c4, %c0_9] : memref<27x512xf32, #tpu.memory_space<vmem>>, vector<1x512xf32>
    %21 = vector.broadcast %20 : vector<1x512xf32> to vector<8x512xf32>
    %22 = arith.mulf %19, %21 : vector<8x512xf32>
    %c63_i32 = arith.constant 63 : i32
    %23 = tpu.dynamic_rotate %1 by %c63_i32 dim 1 : vector<8x512xf32>, i32 -> vector<8x512xf32>
    %c5 = arith.constant 5 : index
    %c0_10 = arith.constant 0 : index
    %24 = vector.load %arg1[%c5, %c0_10] : memref<27x512xf32, #tpu.memory_space<vmem>>, vector<1x512xf32>
    %25 = vector.broadcast %24 : vector<1x512xf32> to vector<8x512xf32>
    %26 = arith.mulf %23, %25 : vector<8x512xf32>
    %c57_i32 = arith.constant 57 : i32
    %27 = tpu.dynamic_rotate %1 by %c57_i32 dim 1 : vector<8x512xf32>, i32 -> vector<8x512xf32>
    %c6 = arith.constant 6 : index
    %c0_11 = arith.constant 0 : index
    %28 = vector.load %arg1[%c6, %c0_11] : memref<27x512xf32, #tpu.memory_space<vmem>>, vector<1x512xf32>
    %29 = vector.broadcast %28 : vector<1x512xf32> to vector<8x512xf32>
    %30 = arith.mulf %27, %29 : vector<8x512xf32>
    %c56_i32 = arith.constant 56 : i32
    %31 = tpu.dynamic_rotate %1 by %c56_i32 dim 1 : vector<8x512xf32>, i32 -> vector<8x512xf32>
    %c7 = arith.constant 7 : index
    %c0_12 = arith.constant 0 : index
    %32 = vector.load %arg1[%c7, %c0_12] : memref<27x512xf32, #tpu.memory_space<vmem>>, vector<1x512xf32>
    %33 = vector.broadcast %32 : vector<1x512xf32> to vector<8x512xf32>
    %34 = arith.mulf %31, %33 : vector<8x512xf32>
    %c55_i32 = arith.constant 55 : i32
    %35 = tpu.dynamic_rotate %1 by %c55_i32 dim 1 : vector<8x512xf32>, i32 -> vector<8x512xf32>
    %c8 = arith.constant 8 : index
    %c0_13 = arith.constant 0 : index
    %36 = vector.load %arg1[%c8, %c0_13] : memref<27x512xf32, #tpu.memory_space<vmem>>, vector<1x512xf32>
    %37 = vector.broadcast %36 : vector<1x512xf32> to vector<8x512xf32>
    %38 = arith.mulf %35, %37 : vector<8x512xf32>
    %c9_i32 = arith.constant 9 : i32
    %39 = tpu.dynamic_rotate %1 by %c9_i32 dim 1 : vector<8x512xf32>, i32 -> vector<8x512xf32>
    %c9 = arith.constant 9 : index
    %c0_14 = arith.constant 0 : index
    %40 = vector.load %arg1[%c9, %c0_14] : memref<27x512xf32, #tpu.memory_space<vmem>>, vector<1x512xf32>
    %41 = vector.broadcast %40 : vector<1x512xf32> to vector<8x512xf32>
    %42 = arith.mulf %39, %41 : vector<8x512xf32>
    %c8_i32 = arith.constant 8 : i32
    %43 = tpu.dynamic_rotate %1 by %c8_i32 dim 1 : vector<8x512xf32>, i32 -> vector<8x512xf32>
    %c10 = arith.constant 10 : index
    %c0_15 = arith.constant 0 : index
    %44 = vector.load %arg1[%c10, %c0_15] : memref<27x512xf32, #tpu.memory_space<vmem>>, vector<1x512xf32>
    %45 = vector.broadcast %44 : vector<1x512xf32> to vector<8x512xf32>
    %46 = arith.mulf %43, %45 : vector<8x512xf32>
    %c7_i32 = arith.constant 7 : i32
    %47 = tpu.dynamic_rotate %1 by %c7_i32 dim 1 : vector<8x512xf32>, i32 -> vector<8x512xf32>
    %c11 = arith.constant 11 : index
    %c0_16 = arith.constant 0 : index
    %48 = vector.load %arg1[%c11, %c0_16] : memref<27x512xf32, #tpu.memory_space<vmem>>, vector<1x512xf32>
    %49 = vector.broadcast %48 : vector<1x512xf32> to vector<8x512xf32>
    %50 = arith.mulf %47, %49 : vector<8x512xf32>
    %c1_i32 = arith.constant 1 : i32
    %51 = tpu.dynamic_rotate %1 by %c1_i32 dim 1 : vector<8x512xf32>, i32 -> vector<8x512xf32>
    %c12 = arith.constant 12 : index
    %c0_17 = arith.constant 0 : index
    %52 = vector.load %arg1[%c12, %c0_17] : memref<27x512xf32, #tpu.memory_space<vmem>>, vector<1x512xf32>
    %53 = vector.broadcast %52 : vector<1x512xf32> to vector<8x512xf32>
    %54 = arith.mulf %51, %53 : vector<8x512xf32>
    %c511_i32 = arith.constant 511 : i32
    %55 = tpu.dynamic_rotate %1 by %c511_i32 dim 1 : vector<8x512xf32>, i32 -> vector<8x512xf32>
    %c14 = arith.constant 14 : index
    %c0_18 = arith.constant 0 : index
    %56 = vector.load %arg1[%c14, %c0_18] : memref<27x512xf32, #tpu.memory_space<vmem>>, vector<1x512xf32>
    %57 = vector.broadcast %56 : vector<1x512xf32> to vector<8x512xf32>
    %58 = arith.mulf %55, %57 : vector<8x512xf32>
    %c505_i32 = arith.constant 505 : i32
    %59 = tpu.dynamic_rotate %1 by %c505_i32 dim 1 : vector<8x512xf32>, i32 -> vector<8x512xf32>
    %c15 = arith.constant 15 : index
    %c0_19 = arith.constant 0 : index
    %60 = vector.load %arg1[%c15, %c0_19] : memref<27x512xf32, #tpu.memory_space<vmem>>, vector<1x512xf32>
    %61 = vector.broadcast %60 : vector<1x512xf32> to vector<8x512xf32>
    %62 = arith.mulf %59, %61 : vector<8x512xf32>
    %c504_i32 = arith.constant 504 : i32
    %63 = tpu.dynamic_rotate %1 by %c504_i32 dim 1 : vector<8x512xf32>, i32 -> vector<8x512xf32>
    %c16 = arith.constant 16 : index
    %c0_20 = arith.constant 0 : index
    %64 = vector.load %arg1[%c16, %c0_20] : memref<27x512xf32, #tpu.memory_space<vmem>>, vector<1x512xf32>
    %65 = vector.broadcast %64 : vector<1x512xf32> to vector<8x512xf32>
    %66 = arith.mulf %63, %65 : vector<8x512xf32>
    %c503_i32 = arith.constant 503 : i32
    %67 = tpu.dynamic_rotate %1 by %c503_i32 dim 1 : vector<8x512xf32>, i32 -> vector<8x512xf32>
    %c17 = arith.constant 17 : index
    %c0_21 = arith.constant 0 : index
    %68 = vector.load %arg1[%c17, %c0_21] : memref<27x512xf32, #tpu.memory_space<vmem>>, vector<1x512xf32>
    %69 = vector.broadcast %68 : vector<1x512xf32> to vector<8x512xf32>
    %70 = arith.mulf %67, %69 : vector<8x512xf32>
    %c457_i32 = arith.constant 457 : i32
    %71 = tpu.dynamic_rotate %1 by %c457_i32 dim 1 : vector<8x512xf32>, i32 -> vector<8x512xf32>
    %c18 = arith.constant 18 : index
    %c0_22 = arith.constant 0 : index
    %72 = vector.load %arg1[%c18, %c0_22] : memref<27x512xf32, #tpu.memory_space<vmem>>, vector<1x512xf32>
    %73 = vector.broadcast %72 : vector<1x512xf32> to vector<8x512xf32>
    %74 = arith.mulf %71, %73 : vector<8x512xf32>
    %c456_i32 = arith.constant 456 : i32
    %75 = tpu.dynamic_rotate %1 by %c456_i32 dim 1 : vector<8x512xf32>, i32 -> vector<8x512xf32>
    %c19 = arith.constant 19 : index
    %c0_23 = arith.constant 0 : index
    %76 = vector.load %arg1[%c19, %c0_23] : memref<27x512xf32, #tpu.memory_space<vmem>>, vector<1x512xf32>
    %77 = vector.broadcast %76 : vector<1x512xf32> to vector<8x512xf32>
    %78 = arith.mulf %75, %77 : vector<8x512xf32>
    %c455_i32 = arith.constant 455 : i32
    %79 = tpu.dynamic_rotate %1 by %c455_i32 dim 1 : vector<8x512xf32>, i32 -> vector<8x512xf32>
    %c20 = arith.constant 20 : index
    %c0_24 = arith.constant 0 : index
    %80 = vector.load %arg1[%c20, %c0_24] : memref<27x512xf32, #tpu.memory_space<vmem>>, vector<1x512xf32>
    %81 = vector.broadcast %80 : vector<1x512xf32> to vector<8x512xf32>
    %82 = arith.mulf %79, %81 : vector<8x512xf32>
    %c449_i32 = arith.constant 449 : i32
    %83 = tpu.dynamic_rotate %1 by %c449_i32 dim 1 : vector<8x512xf32>, i32 -> vector<8x512xf32>
    %c21 = arith.constant 21 : index
    %c0_25 = arith.constant 0 : index
    %84 = vector.load %arg1[%c21, %c0_25] : memref<27x512xf32, #tpu.memory_space<vmem>>, vector<1x512xf32>
    %85 = vector.broadcast %84 : vector<1x512xf32> to vector<8x512xf32>
    %86 = arith.mulf %83, %85 : vector<8x512xf32>
    %c448_i32 = arith.constant 448 : i32
    %87 = tpu.dynamic_rotate %1 by %c448_i32 dim 1 : vector<8x512xf32>, i32 -> vector<8x512xf32>
    %c22 = arith.constant 22 : index
    %c0_26 = arith.constant 0 : index
    %88 = vector.load %arg1[%c22, %c0_26] : memref<27x512xf32, #tpu.memory_space<vmem>>, vector<1x512xf32>
    %89 = vector.broadcast %88 : vector<1x512xf32> to vector<8x512xf32>
    %90 = arith.mulf %87, %89 : vector<8x512xf32>
    %c447_i32 = arith.constant 447 : i32
    %91 = tpu.dynamic_rotate %1 by %c447_i32 dim 1 : vector<8x512xf32>, i32 -> vector<8x512xf32>
    %c23 = arith.constant 23 : index
    %c0_27 = arith.constant 0 : index
    %92 = vector.load %arg1[%c23, %c0_27] : memref<27x512xf32, #tpu.memory_space<vmem>>, vector<1x512xf32>
    %93 = vector.broadcast %92 : vector<1x512xf32> to vector<8x512xf32>
    %94 = arith.mulf %91, %93 : vector<8x512xf32>
    %c441_i32 = arith.constant 441 : i32
    %95 = tpu.dynamic_rotate %1 by %c441_i32 dim 1 : vector<8x512xf32>, i32 -> vector<8x512xf32>
    %c24 = arith.constant 24 : index
    %c0_28 = arith.constant 0 : index
    %96 = vector.load %arg1[%c24, %c0_28] : memref<27x512xf32, #tpu.memory_space<vmem>>, vector<1x512xf32>
    %97 = vector.broadcast %96 : vector<1x512xf32> to vector<8x512xf32>
    %98 = arith.mulf %95, %97 : vector<8x512xf32>
    %c440_i32 = arith.constant 440 : i32
    %99 = tpu.dynamic_rotate %1 by %c440_i32 dim 1 : vector<8x512xf32>, i32 -> vector<8x512xf32>
    %c25 = arith.constant 25 : index
    %c0_29 = arith.constant 0 : index
    %100 = vector.load %arg1[%c25, %c0_29] : memref<27x512xf32, #tpu.memory_space<vmem>>, vector<1x512xf32>
    %101 = vector.broadcast %100 : vector<1x512xf32> to vector<8x512xf32>
    %102 = arith.mulf %99, %101 : vector<8x512xf32>
    %c439_i32 = arith.constant 439 : i32
    %103 = tpu.dynamic_rotate %1 by %c439_i32 dim 1 : vector<8x512xf32>, i32 -> vector<8x512xf32>
    %c26 = arith.constant 26 : index
    %c0_30 = arith.constant 0 : index
    %104 = vector.load %arg1[%c26, %c0_30] : memref<27x512xf32, #tpu.memory_space<vmem>>, vector<1x512xf32>
    %105 = vector.broadcast %104 : vector<1x512xf32> to vector<8x512xf32>
    %106 = arith.mulf %103, %105 : vector<8x512xf32>
    %107 = tpu.concatenate %6, %10, %14, %18, %22, %26, %30, %34, %38, %42, %46, %50, %54, %1, %58, %62 in 0 : vector<8x512xf32>, vector<8x512xf32>, vector<8x512xf32>, vector<8x512xf32>, vector<8x512xf32>, vector<8x512xf32>, vector<8x512xf32>, vector<8x512xf32>, vector<8x512xf32>, vector<8x512xf32>, vector<8x512xf32>, vector<8x512xf32>, vector<8x512xf32>, vector<8x512xf32>, vector<8x512xf32>, vector<8x512xf32> -> vector<128x512xf32>
    %108 = tpu.concatenate %66, %70, %74, %78, %82, %86, %90, %94, %98, %102, %106 in 0 : vector<8x512xf32>, vector<8x512xf32>, vector<8x512xf32>, vector<8x512xf32>, vector<8x512xf32>, vector<8x512xf32>, vector<8x512xf32>, vector<8x512xf32>, vector<8x512xf32>, vector<8x512xf32>, vector<8x512xf32> -> vector<88x512xf32>
    %109 = tpu.concatenate %107, %108 in 0 : vector<128x512xf32>, vector<88x512xf32> -> vector<216x512xf32>
    %cst = arith.constant dense<0.000000e+00> : vector<8x512xf32>
    %110 = tpu.matmul %2, %109, %cst {dimension_numbers = #tpu.dot_dimension_numbers<[1], [0], [0], [1], [0, 0, 1, 1], [], []>} : vector<8x216xf32>, vector<216x512xf32>, vector<8x512xf32> -> vector<8x512xf32>
    %c0_31 = arith.constant 0 : index
    %c0_32 = arith.constant 0 : index
    %111 = vector.load %arg4[%c0_31, %c0_32] : memref<8x1xf32, #tpu.memory_space<vmem>>, vector<8x1xf32>
    %112 = vector.broadcast %111 : vector<8x1xf32> to vector<8x512xf32>
    %113 = arith.addf %110, %112 : vector<8x512xf32>
    %cst_33 = arith.constant dense<0.000000e+00> : vector<8xf32>
    %114 = vector.multi_reduction <add>, %113, %cst_33 [1] : vector<8x512xf32> to vector<8xf32>
    %115 = vector.shape_cast %114 : vector<8xf32> to vector<8x1xf32>
    %cst_34 = arith.constant 0.001953125 : f32
    %116 = vector.broadcast %cst_34 : f32 to vector<8x1xf32>
    %117 = arith.mulf %115, %116 : vector<8x1xf32>
    %118 = arith.mulf %113, %113 : vector<8x512xf32>
    %cst_35 = arith.constant dense<0.000000e+00> : vector<8xf32>
    %119 = vector.multi_reduction <add>, %118, %cst_35 [1] : vector<8x512xf32> to vector<8xf32>
    %120 = vector.shape_cast %119 : vector<8xf32> to vector<8x1xf32>
    %cst_36 = arith.constant 0.001953125 : f32
    %121 = vector.broadcast %cst_36 : f32 to vector<8x1xf32>
    %122 = arith.mulf %120, %121 : vector<8x1xf32>
    %123 = arith.mulf %117, %117 : vector<8x1xf32>
    %124 = arith.subf %122, %123 : vector<8x1xf32>
    %125 = vector.broadcast %117 : vector<8x1xf32> to vector<8x512xf32>
    %126 = arith.subf %113, %125 : vector<8x512xf32>
    %cst_37 = arith.constant 9.99999974E-6 : f32
    %127 = vector.broadcast %cst_37 : f32 to vector<8x1xf32>
    %128 = arith.addf %124, %127 : vector<8x1xf32>
    %129 = math.rsqrt %128 : vector<8x1xf32>
    %130 = vector.broadcast %129 : vector<8x1xf32> to vector<8x512xf32>
    %131 = arith.mulf %126, %130 : vector<8x512xf32>
    %cst_38 = arith.constant 0.000000e+00 : f32
    %132 = vector.broadcast %cst_38 : f32 to vector<8x512xf32>
    %133 = arith.maximumf %131, %132 : vector<8x512xf32>
    %c0_39 = arith.constant 0 : index
    %c0_40 = arith.constant 0 : index
    %134 = vector.load %arg5[%c0_39, %c0_40] : memref<8x216xf32, #tpu.memory_space<vmem>>, vector<8x216xf32>
    %c73_i32_41 = arith.constant 73 : i32
    %135 = tpu.dynamic_rotate %133 by %c73_i32_41 dim 1 : vector<8x512xf32>, i32 -> vector<8x512xf32>
    %c0_42 = arith.constant 0 : index
    %c0_43 = arith.constant 0 : index
    %136 = vector.load %arg1[%c0_42, %c0_43] : memref<27x512xf32, #tpu.memory_space<vmem>>, vector<1x512xf32>
    %137 = vector.broadcast %136 : vector<1x512xf32> to vector<8x512xf32>
    %138 = arith.mulf %135, %137 : vector<8x512xf32>
    %c72_i32_44 = arith.constant 72 : i32
    %139 = tpu.dynamic_rotate %133 by %c72_i32_44 dim 1 : vector<8x512xf32>, i32 -> vector<8x512xf32>
    %c1_45 = arith.constant 1 : index
    %c0_46 = arith.constant 0 : index
    %140 = vector.load %arg1[%c1_45, %c0_46] : memref<27x512xf32, #tpu.memory_space<vmem>>, vector<1x512xf32>
    %141 = vector.broadcast %140 : vector<1x512xf32> to vector<8x512xf32>
    %142 = arith.mulf %139, %141 : vector<8x512xf32>
    %c71_i32_47 = arith.constant 71 : i32
    %143 = tpu.dynamic_rotate %133 by %c71_i32_47 dim 1 : vector<8x512xf32>, i32 -> vector<8x512xf32>
    %c2_48 = arith.constant 2 : index
    %c0_49 = arith.constant 0 : index
    %144 = vector.load %arg1[%c2_48, %c0_49] : memref<27x512xf32, #tpu.memory_space<vmem>>, vector<1x512xf32>
    %145 = vector.broadcast %144 : vector<1x512xf32> to vector<8x512xf32>
    %146 = arith.mulf %143, %145 : vector<8x512xf32>
    %c65_i32_50 = arith.constant 65 : i32
    %147 = tpu.dynamic_rotate %133 by %c65_i32_50 dim 1 : vector<8x512xf32>, i32 -> vector<8x512xf32>
    %c3_51 = arith.constant 3 : index
    %c0_52 = arith.constant 0 : index
    %148 = vector.load %arg1[%c3_51, %c0_52] : memref<27x512xf32, #tpu.memory_space<vmem>>, vector<1x512xf32>
    %149 = vector.broadcast %148 : vector<1x512xf32> to vector<8x512xf32>
    %150 = arith.mulf %147, %149 : vector<8x512xf32>
    %c64_i32_53 = arith.constant 64 : i32
    %151 = tpu.dynamic_rotate %133 by %c64_i32_53 dim 1 : vector<8x512xf32>, i32 -> vector<8x512xf32>
    %c4_54 = arith.constant 4 : index
    %c0_55 = arith.constant 0 : index
    %152 = vector.load %arg1[%c4_54, %c0_55] : memref<27x512xf32, #tpu.memory_space<vmem>>, vector<1x512xf32>
    %153 = vector.broadcast %152 : vector<1x512xf32> to vector<8x512xf32>
    %154 = arith.mulf %151, %153 : vector<8x512xf32>
    %c63_i32_56 = arith.constant 63 : i32
    %155 = tpu.dynamic_rotate %133 by %c63_i32_56 dim 1 : vector<8x512xf32>, i32 -> vector<8x512xf32>
    %c5_57 = arith.constant 5 : index
    %c0_58 = arith.constant 0 : index
    %156 = vector.load %arg1[%c5_57, %c0_58] : memref<27x512xf32, #tpu.memory_space<vmem>>, vector<1x512xf32>
    %157 = vector.broadcast %156 : vector<1x512xf32> to vector<8x512xf32>
    %158 = arith.mulf %155, %157 : vector<8x512xf32>
    %c57_i32_59 = arith.constant 57 : i32
    %159 = tpu.dynamic_rotate %133 by %c57_i32_59 dim 1 : vector<8x512xf32>, i32 -> vector<8x512xf32>
    %c6_60 = arith.constant 6 : index
    %c0_61 = arith.constant 0 : index
    %160 = vector.load %arg1[%c6_60, %c0_61] : memref<27x512xf32, #tpu.memory_space<vmem>>, vector<1x512xf32>
    %161 = vector.broadcast %160 : vector<1x512xf32> to vector<8x512xf32>
    %162 = arith.mulf %159, %161 : vector<8x512xf32>
    %c56_i32_62 = arith.constant 56 : i32
    %163 = tpu.dynamic_rotate %133 by %c56_i32_62 dim 1 : vector<8x512xf32>, i32 -> vector<8x512xf32>
    %c7_63 = arith.constant 7 : index
    %c0_64 = arith.constant 0 : index
    %164 = vector.load %arg1[%c7_63, %c0_64] : memref<27x512xf32, #tpu.memory_space<vmem>>, vector<1x512xf32>
    %165 = vector.broadcast %164 : vector<1x512xf32> to vector<8x512xf32>
    %166 = arith.mulf %163, %165 : vector<8x512xf32>
    %c55_i32_65 = arith.constant 55 : i32
    %167 = tpu.dynamic_rotate %133 by %c55_i32_65 dim 1 : vector<8x512xf32>, i32 -> vector<8x512xf32>
    %c8_66 = arith.constant 8 : index
    %c0_67 = arith.constant 0 : index
    %168 = vector.load %arg1[%c8_66, %c0_67] : memref<27x512xf32, #tpu.memory_space<vmem>>, vector<1x512xf32>
    %169 = vector.broadcast %168 : vector<1x512xf32> to vector<8x512xf32>
    %170 = arith.mulf %167, %169 : vector<8x512xf32>
    %c9_i32_68 = arith.constant 9 : i32
    %171 = tpu.dynamic_rotate %133 by %c9_i32_68 dim 1 : vector<8x512xf32>, i32 -> vector<8x512xf32>
    %c9_69 = arith.constant 9 : index
    %c0_70 = arith.constant 0 : index
    %172 = vector.load %arg1[%c9_69, %c0_70] : memref<27x512xf32, #tpu.memory_space<vmem>>, vector<1x512xf32>
    %173 = vector.broadcast %172 : vector<1x512xf32> to vector<8x512xf32>
    %174 = arith.mulf %171, %173 : vector<8x512xf32>
    %c8_i32_71 = arith.constant 8 : i32
    %175 = tpu.dynamic_rotate %133 by %c8_i32_71 dim 1 : vector<8x512xf32>, i32 -> vector<8x512xf32>
    %c10_72 = arith.constant 10 : index
    %c0_73 = arith.constant 0 : index
    %176 = vector.load %arg1[%c10_72, %c0_73] : memref<27x512xf32, #tpu.memory_space<vmem>>, vector<1x512xf32>
    %177 = vector.broadcast %176 : vector<1x512xf32> to vector<8x512xf32>
    %178 = arith.mulf %175, %177 : vector<8x512xf32>
    %c7_i32_74 = arith.constant 7 : i32
    %179 = tpu.dynamic_rotate %133 by %c7_i32_74 dim 1 : vector<8x512xf32>, i32 -> vector<8x512xf32>
    %c11_75 = arith.constant 11 : index
    %c0_76 = arith.constant 0 : index
    %180 = vector.load %arg1[%c11_75, %c0_76] : memref<27x512xf32, #tpu.memory_space<vmem>>, vector<1x512xf32>
    %181 = vector.broadcast %180 : vector<1x512xf32> to vector<8x512xf32>
    %182 = arith.mulf %179, %181 : vector<8x512xf32>
    %c1_i32_77 = arith.constant 1 : i32
    %183 = tpu.dynamic_rotate %133 by %c1_i32_77 dim 1 : vector<8x512xf32>, i32 -> vector<8x512xf32>
    %c12_78 = arith.constant 12 : index
    %c0_79 = arith.constant 0 : index
    %184 = vector.load %arg1[%c12_78, %c0_79] : memref<27x512xf32, #tpu.memory_space<vmem>>, vector<1x512xf32>
    %185 = vector.broadcast %184 : vector<1x512xf32> to vector<8x512xf32>
    %186 = arith.mulf %183, %185 : vector<8x512xf32>
    %c511_i32_80 = arith.constant 511 : i32
    %187 = tpu.dynamic_rotate %133 by %c511_i32_80 dim 1 : vector<8x512xf32>, i32 -> vector<8x512xf32>
    %c14_81 = arith.constant 14 : index
    %c0_82 = arith.constant 0 : index
    %188 = vector.load %arg1[%c14_81, %c0_82] : memref<27x512xf32, #tpu.memory_space<vmem>>, vector<1x512xf32>
    %189 = vector.broadcast %188 : vector<1x512xf32> to vector<8x512xf32>
    %190 = arith.mulf %187, %189 : vector<8x512xf32>
    %c505_i32_83 = arith.constant 505 : i32
    %191 = tpu.dynamic_rotate %133 by %c505_i32_83 dim 1 : vector<8x512xf32>, i32 -> vector<8x512xf32>
    %c15_84 = arith.constant 15 : index
    %c0_85 = arith.constant 0 : index
    %192 = vector.load %arg1[%c15_84, %c0_85] : memref<27x512xf32, #tpu.memory_space<vmem>>, vector<1x512xf32>
    %193 = vector.broadcast %192 : vector<1x512xf32> to vector<8x512xf32>
    %194 = arith.mulf %191, %193 : vector<8x512xf32>
    %c504_i32_86 = arith.constant 504 : i32
    %195 = tpu.dynamic_rotate %133 by %c504_i32_86 dim 1 : vector<8x512xf32>, i32 -> vector<8x512xf32>
    %c16_87 = arith.constant 16 : index
    %c0_88 = arith.constant 0 : index
    %196 = vector.load %arg1[%c16_87, %c0_88] : memref<27x512xf32, #tpu.memory_space<vmem>>, vector<1x512xf32>
    %197 = vector.broadcast %196 : vector<1x512xf32> to vector<8x512xf32>
    %198 = arith.mulf %195, %197 : vector<8x512xf32>
    %c503_i32_89 = arith.constant 503 : i32
    %199 = tpu.dynamic_rotate %133 by %c503_i32_89 dim 1 : vector<8x512xf32>, i32 -> vector<8x512xf32>
    %c17_90 = arith.constant 17 : index
    %c0_91 = arith.constant 0 : index
    %200 = vector.load %arg1[%c17_90, %c0_91] : memref<27x512xf32, #tpu.memory_space<vmem>>, vector<1x512xf32>
    %201 = vector.broadcast %200 : vector<1x512xf32> to vector<8x512xf32>
    %202 = arith.mulf %199, %201 : vector<8x512xf32>
    %c457_i32_92 = arith.constant 457 : i32
    %203 = tpu.dynamic_rotate %133 by %c457_i32_92 dim 1 : vector<8x512xf32>, i32 -> vector<8x512xf32>
    %c18_93 = arith.constant 18 : index
    %c0_94 = arith.constant 0 : index
    %204 = vector.load %arg1[%c18_93, %c0_94] : memref<27x512xf32, #tpu.memory_space<vmem>>, vector<1x512xf32>
    %205 = vector.broadcast %204 : vector<1x512xf32> to vector<8x512xf32>
    %206 = arith.mulf %203, %205 : vector<8x512xf32>
    %c456_i32_95 = arith.constant 456 : i32
    %207 = tpu.dynamic_rotate %133 by %c456_i32_95 dim 1 : vector<8x512xf32>, i32 -> vector<8x512xf32>
    %c19_96 = arith.constant 19 : index
    %c0_97 = arith.constant 0 : index
    %208 = vector.load %arg1[%c19_96, %c0_97] : memref<27x512xf32, #tpu.memory_space<vmem>>, vector<1x512xf32>
    %209 = vector.broadcast %208 : vector<1x512xf32> to vector<8x512xf32>
    %210 = arith.mulf %207, %209 : vector<8x512xf32>
    %c455_i32_98 = arith.constant 455 : i32
    %211 = tpu.dynamic_rotate %133 by %c455_i32_98 dim 1 : vector<8x512xf32>, i32 -> vector<8x512xf32>
    %c20_99 = arith.constant 20 : index
    %c0_100 = arith.constant 0 : index
    %212 = vector.load %arg1[%c20_99, %c0_100] : memref<27x512xf32, #tpu.memory_space<vmem>>, vector<1x512xf32>
    %213 = vector.broadcast %212 : vector<1x512xf32> to vector<8x512xf32>
    %214 = arith.mulf %211, %213 : vector<8x512xf32>
    %c449_i32_101 = arith.constant 449 : i32
    %215 = tpu.dynamic_rotate %133 by %c449_i32_101 dim 1 : vector<8x512xf32>, i32 -> vector<8x512xf32>
    %c21_102 = arith.constant 21 : index
    %c0_103 = arith.constant 0 : index
    %216 = vector.load %arg1[%c21_102, %c0_103] : memref<27x512xf32, #tpu.memory_space<vmem>>, vector<1x512xf32>
    %217 = vector.broadcast %216 : vector<1x512xf32> to vector<8x512xf32>
    %218 = arith.mulf %215, %217 : vector<8x512xf32>
    %c448_i32_104 = arith.constant 448 : i32
    %219 = tpu.dynamic_rotate %133 by %c448_i32_104 dim 1 : vector<8x512xf32>, i32 -> vector<8x512xf32>
    %c22_105 = arith.constant 22 : index
    %c0_106 = arith.constant 0 : index
    %220 = vector.load %arg1[%c22_105, %c0_106] : memref<27x512xf32, #tpu.memory_space<vmem>>, vector<1x512xf32>
    %221 = vector.broadcast %220 : vector<1x512xf32> to vector<8x512xf32>
    %222 = arith.mulf %219, %221 : vector<8x512xf32>
    %c447_i32_107 = arith.constant 447 : i32
    %223 = tpu.dynamic_rotate %133 by %c447_i32_107 dim 1 : vector<8x512xf32>, i32 -> vector<8x512xf32>
    %c23_108 = arith.constant 23 : index
    %c0_109 = arith.constant 0 : index
    %224 = vector.load %arg1[%c23_108, %c0_109] : memref<27x512xf32, #tpu.memory_space<vmem>>, vector<1x512xf32>
    %225 = vector.broadcast %224 : vector<1x512xf32> to vector<8x512xf32>
    %226 = arith.mulf %223, %225 : vector<8x512xf32>
    %c441_i32_110 = arith.constant 441 : i32
    %227 = tpu.dynamic_rotate %133 by %c441_i32_110 dim 1 : vector<8x512xf32>, i32 -> vector<8x512xf32>
    %c24_111 = arith.constant 24 : index
    %c0_112 = arith.constant 0 : index
    %228 = vector.load %arg1[%c24_111, %c0_112] : memref<27x512xf32, #tpu.memory_space<vmem>>, vector<1x512xf32>
    %229 = vector.broadcast %228 : vector<1x512xf32> to vector<8x512xf32>
    %230 = arith.mulf %227, %229 : vector<8x512xf32>
    %c440_i32_113 = arith.constant 440 : i32
    %231 = tpu.dynamic_rotate %133 by %c440_i32_113 dim 1 : vector<8x512xf32>, i32 -> vector<8x512xf32>
    %c25_114 = arith.constant 25 : index
    %c0_115 = arith.constant 0 : index
    %232 = vector.load %arg1[%c25_114, %c0_115] : memref<27x512xf32, #tpu.memory_space<vmem>>, vector<1x512xf32>
    %233 = vector.broadcast %232 : vector<1x512xf32> to vector<8x512xf32>
    %234 = arith.mulf %231, %233 : vector<8x512xf32>
    %c439_i32_116 = arith.constant 439 : i32
    %235 = tpu.dynamic_rotate %133 by %c439_i32_116 dim 1 : vector<8x512xf32>, i32 -> vector<8x512xf32>
    %c26_117 = arith.constant 26 : index
    %c0_118 = arith.constant 0 : index
    %236 = vector.load %arg1[%c26_117, %c0_118] : memref<27x512xf32, #tpu.memory_space<vmem>>, vector<1x512xf32>
    %237 = vector.broadcast %236 : vector<1x512xf32> to vector<8x512xf32>
    %238 = arith.mulf %235, %237 : vector<8x512xf32>
    %239 = tpu.concatenate %138, %142, %146, %150, %154, %158, %162, %166, %170, %174, %178, %182, %186, %133, %190, %194 in 0 : vector<8x512xf32>, vector<8x512xf32>, vector<8x512xf32>, vector<8x512xf32>, vector<8x512xf32>, vector<8x512xf32>, vector<8x512xf32>, vector<8x512xf32>, vector<8x512xf32>, vector<8x512xf32>, vector<8x512xf32>, vector<8x512xf32>, vector<8x512xf32>, vector<8x512xf32>, vector<8x512xf32>, vector<8x512xf32> -> vector<128x512xf32>
    %240 = tpu.concatenate %198, %202, %206, %210, %214, %218, %222, %226, %230, %234, %238 in 0 : vector<8x512xf32>, vector<8x512xf32>, vector<8x512xf32>, vector<8x512xf32>, vector<8x512xf32>, vector<8x512xf32>, vector<8x512xf32>, vector<8x512xf32>, vector<8x512xf32>, vector<8x512xf32>, vector<8x512xf32> -> vector<88x512xf32>
    %241 = tpu.concatenate %239, %240 in 0 : vector<128x512xf32>, vector<88x512xf32> -> vector<216x512xf32>
    %cst_119 = arith.constant dense<0.000000e+00> : vector<8x512xf32>
    %242 = tpu.matmul %134, %241, %cst_119 {dimension_numbers = #tpu.dot_dimension_numbers<[1], [0], [0], [1], [0, 0, 1, 1], [], []>} : vector<8x216xf32>, vector<216x512xf32>, vector<8x512xf32> -> vector<8x512xf32>
    %c0_120 = arith.constant 0 : index
    %c0_121 = arith.constant 0 : index
    %243 = vector.load %arg6[%c0_120, %c0_121] : memref<8x1xf32, #tpu.memory_space<vmem>>, vector<8x1xf32>
    %244 = vector.broadcast %243 : vector<8x1xf32> to vector<8x512xf32>
    %245 = arith.addf %242, %244 : vector<8x512xf32>
    %cst_122 = arith.constant dense<0.000000e+00> : vector<8xf32>
    %246 = vector.multi_reduction <add>, %245, %cst_122 [1] : vector<8x512xf32> to vector<8xf32>
    %247 = vector.shape_cast %246 : vector<8xf32> to vector<8x1xf32>
    %cst_123 = arith.constant 0.001953125 : f32
    %248 = vector.broadcast %cst_123 : f32 to vector<8x1xf32>
    %249 = arith.mulf %247, %248 : vector<8x1xf32>
    %250 = arith.mulf %245, %245 : vector<8x512xf32>
    %cst_124 = arith.constant dense<0.000000e+00> : vector<8xf32>
    %251 = vector.multi_reduction <add>, %250, %cst_124 [1] : vector<8x512xf32> to vector<8xf32>
    %252 = vector.shape_cast %251 : vector<8xf32> to vector<8x1xf32>
    %cst_125 = arith.constant 0.001953125 : f32
    %253 = vector.broadcast %cst_125 : f32 to vector<8x1xf32>
    %254 = arith.mulf %252, %253 : vector<8x1xf32>
    %255 = arith.mulf %249, %249 : vector<8x1xf32>
    %256 = arith.subf %254, %255 : vector<8x1xf32>
    %257 = vector.broadcast %249 : vector<8x1xf32> to vector<8x512xf32>
    %258 = arith.subf %245, %257 : vector<8x512xf32>
    %cst_126 = arith.constant 9.99999974E-6 : f32
    %259 = vector.broadcast %cst_126 : f32 to vector<8x1xf32>
    %260 = arith.addf %256, %259 : vector<8x1xf32>
    %261 = math.rsqrt %260 : vector<8x1xf32>
    %262 = vector.broadcast %261 : vector<8x1xf32> to vector<8x512xf32>
    %263 = arith.mulf %258, %262 : vector<8x512xf32>
    %cst_127 = arith.constant 0.000000e+00 : f32
    %264 = vector.broadcast %cst_127 : f32 to vector<8x512xf32>
    %265 = arith.maximumf %263, %264 : vector<8x512xf32>
    %c0_128 = arith.constant 0 : index
    %c0_129 = arith.constant 0 : index
    %266 = vector.load %arg7[%c0_128, %c0_129] : memref<8x8xf32, #tpu.memory_space<vmem>>, vector<8x8xf32>
    %cst_130 = arith.constant dense<0.000000e+00> : vector<8x512xf32>
    %267 = tpu.matmul %266, %1, %cst_130 {dimension_numbers = #tpu.dot_dimension_numbers<[1], [0], [0], [1], [0, 0, 1, 1], [], []>} : vector<8x8xf32>, vector<8x512xf32>, vector<8x512xf32> -> vector<8x512xf32>
    %c0_131 = arith.constant 0 : index
    %c0_132 = arith.constant 0 : index
    %268 = vector.load %arg8[%c0_131, %c0_132] : memref<8x1xf32, #tpu.memory_space<vmem>>, vector<8x1xf32>
    %269 = vector.broadcast %268 : vector<8x1xf32> to vector<8x512xf32>
    %270 = arith.addf %267, %269 : vector<8x512xf32>
    %271 = arith.addf %265, %270 : vector<8x512xf32>
    %c0_133 = arith.constant 0 : index
    %c0_134 = arith.constant 0 : index
    %c0_135 = arith.constant 0 : index
    %272 = vector.load %arg9[%c0_133, %c0_134, %c0_135] : memref<1x8x512xf32, #tpu.memory_space<vmem>>, vector<1x8x512xf32>
    %273 = vector.shape_cast %272 : vector<1x8x512xf32> to vector<8x512xf32>
    %274 = vector.shape_cast %271 : vector<8x512xf32> to vector<1x8x512xf32>
    tpu.vector_store %arg9[%c0_133, %c0_134, %c0_135], %274 {strides = array<i32>} : memref<1x8x512xf32, #tpu.memory_space<vmem>>, vector<1x8x512xf32>,
    return
  }
  func.func @transform_0(%arg0: i32) -> (i32, i32) {
    %c0_i32 = arith.constant 0 : i32
    %c0_i32_0 = arith.constant 0 : i32
    %c0_i32_1 = arith.constant 0 : i32
    return %c0_i32, %c0_i32_0 : i32, i32
  }
  func.func @transform_1(%arg0: i32) -> (i32, i32, i32) {
    %c0_i32 = arith.constant 0 : i32
    %c0_i32_0 = arith.constant 0 : i32
    %c0_i32_1 = arith.constant 0 : i32
    return %arg0, %c0_i32, %c0_i32_0 : i32, i32, i32
  }
  func.func @transform_2(%arg0: i32) -> (i32, i32) {
    %c0_i32 = arith.constant 0 : i32
    %c0_i32_0 = arith.constant 0 : i32
    %c0_i32_1 = arith.constant 0 : i32
    return %c0_i32, %c0_i32_0 : i32, i32
  }
  func.func @transform_3(%arg0: i32) -> (i32, i32) {
    %c0_i32 = arith.constant 0 : i32
    %c0_i32_0 = arith.constant 0 : i32
    %c0_i32_1 = arith.constant 0 : i32
    return %c0_i32, %c0_i32_0 : i32, i32
  }
  func.func @transform_4(%arg0: i32) -> (i32, i32) {
    %c0_i32 = arith.constant 0 : i32
    %c0_i32_0 = arith.constant 0 : i32
    %c0_i32_1 = arith.constant 0 : i32
    return %c0_i32, %c0_i32_0 : i32, i32
  }
  func.func @transform_5(%arg0: i32) -> (i32, i32) {
    %c0_i32 = arith.constant 0 : i32
    %c0_i32_0 = arith.constant 0 : i32
    %c0_i32_1 = arith.constant 0 : i32
    return %c0_i32, %c0_i32_0 : i32, i32
  }
  func.func @transform_6(%arg0: i32) -> (i32, i32) {
    %c0_i32 = arith.constant 0 : i32
    %c0_i32_0 = arith.constant 0 : i32
    %c0_i32_1 = arith.constant 0 : i32
    return %c0_i32, %c0_i32_0 : i32, i32
  }
  func.func @transform_7(%arg0: i32) -> (i32, i32) {
    %c0_i32 = arith.constant 0 : i32
    %c0_i32_0 = arith.constant 0 : i32
    %c0_i32_1 = arith.constant 0 : i32
    return %c0_i32, %c0_i32_0 : i32, i32
  }
  func.func @transform_8(%arg0: i32) -> (i32, i32, i32) {
    %c0_i32 = arith.constant 0 : i32
    %c0_i32_0 = arith.constant 0 : i32
    %c0_i32_1 = arith.constant 0 : i32
    return %arg0, %c0_i32, %c0_i32_0 : i32, i32, i32
  }
}

</mosaic_0001>

<bundles_post_ra>
// kernel: tpu_custom_call.1
= control target key start
LH: loop header
LB: loop body
LE: loop exit
PB: predicated region body
PF: predicated region fallthrough
CT: control target
= control target key end

     0   :  { %s4324_s0 = inlined_call_operand.hbm [shape: f32[27,512], index: 0, kind: input, shape index: {}]   ;;  %s4325_s1 = inlined_call_operand.hbm [shape: f32[2,8,512], index: 1, kind: input, shape index: {}]   ;;  %s4326_s2 = inlined_call_operand.vmem [shape: f32[8,216], index: 2, kind: input, shape index: {}]   ;;  %s4327_s3 = inlined_call_operand.vmem [shape: f32[8,1], index: 3, kind: input, shape index: {}]   ;;  %s4328_s4 = inlined_call_operand.vmem [shape: f32[8,216], index: 4, kind: input, shape index: {}]   ;;  %s4329_s5 = inlined_call_operand.vmem [shape: f32[8,1], index: 5, kind: input, shape index: {}]   ;;  %s4330_s6 = inlined_call_operand.hbm [shape: f32[8,8], index: 6, kind: input, shape index: {}]   ;;  %s4331_s7 = inlined_call_operand.vmem [shape: f32[8,1], index: 7, kind: input, shape index: {}]   ;;  %s4332_s8 = inlined_call_operand.hbm [shape: f32[2,8,512], index: 8, kind: output, shape index: {}]  }
   0x1   :  { %4451 = sst [smem:[#allocation107_spill]] %s4324_s0 }
   0x2   :  { %4452 = sst [smem:[#allocation108_spill]] %s4330_s6 }
   0x3   :  { %13 = vsyncpa [#allocation3], 0 }
   0x4   :  { %14 = vsyncpa [#allocation6], 0 }
   0x5   :  { %16 = vsyncpa [#allocation6 + $0x1], 0 }
   0x6   :  { %17 = vsyncpa [#allocation4], 0 }
   0x7   :  { %19 = vsyncpa [#allocation4 + $0x1], 0  ;;  %s2570_s27 = smov 0   ;;  %s2572_s28 = smov 0  }
   0x8   :  { %s2574_s29 = smov 0   ;;  %s2576_s30 = smov 0  }
   0x9 LB: > { %s2591_s9 = sadd.s32 4294967295, %s2498_s30   ;;  %s2223_s10 = sadd.s32 4294967294, %s2498_s30   ;;  %s2498_s30 = sphi %s2576_s30, %s4698_s30   ;;  %s2494_s29 = sphi %s2574_s29, %s4697_s29   ;;  %s2490_s28 = sphi %s2572_s28, %s4696_s28   ;;  %s2486_s27 = sphi %s2570_s27, %s4695_s27  }
   0xa   : > { %p66_p0 = scmp.ne.s32.totalorder %s2490_s28, %s2486_s27  ;;  %p4333_p1 = scmp.eq.s32.totalorder %s2591_s9, 0 }
   0xb   : > { %p222_p3 = scmp.eq.s32.totalorder %s2223_s10, 1  ;;  %p2224_p5 = scmp.ge.s32.totalorder %s2498_s30, 1 }
   0xc   : > { %p2600_p4 = por %p4333_p1, %p66_p0  ;;  %p229_p7 = scmp.lt.s32.totalorder %s2498_s30, 3 }
   0xd   : > { %p2605_p6 = por %p222_p3, %p66_p0  ;;  %s2500_s14 = smov [#allocation7]  }
   0xe   : > { %s4453_s11 = scalar_select %p2600_p4, 1, 0 }
   0xf   : > { %s4454_s12 = scalar_select %p2605_p6, 1, 0 }
  0x10   : > { %p2610_p8 = pnand %p2224_p5, %p229_p7  ;;  %s267_s15 = sshll.u32 %s2500_s14, 4  ;;  %s268_s15 = int_to_ptr.vmem [resolvable:$true] %s267_s15 }
  0x11   : > { %s2501_s16 = smov [#allocation2]   ;;  %s2357_s19 = scalar_lea.vmem %s268_s15, 128 }
  0x12   : > { %s4455_s13 = scalar_select %p2610_p8, 1, 0 }
  0x13   : > { %p2261_p10 = pneg %p2610_p8  ;;  %s241_s17 = sshll.u32 %s2501_s16, 4  ;;  %s242_s17 = int_to_ptr.vmem [resolvable:$true] %s241_s17 }
  0x14   : > { %p2358_p13 = scmp.ne.s32.totalorder %s268_s15, %s2357_s19  ;;  %p2365_p5 = scmp.lt.s32.totalorder %s268_s15, %s268_s15 }
  0x15   : > { %p2619_p11 = pnand %p2261_p10, %p4333_p1  ;;  %p2366_p7 = scmp.lt.s32.totalorder %s2357_s19, %s2357_s19 }
  0x17   : > { %p2348_p12 = pneg %p2619_p11  ;;  %p2367_p9 = por %p2366_p7, %p2365_p5 }
  0x19   : > { %p2360_p0 = pnand %p2358_p13, %p2348_p12 }
  0x1b   : > { %p2361_p3 = pneg %p2360_p0 }
  0x1d   : > { %p2368_p2 = pnand %p2367_p9, %p2361_p3 }
  0x1f   : > { %2371 = shalt.err (!%p2368_p2)
}
  0x20   : > { %s4457_s6 = sld [smem:[#allocation108_spill]]  ;;  %s2383_s22 = scalar_lea.vmem %s242_s17, 2048 }
  0x21   : > { %p2384_p10 = scmp.ne.s32.totalorder %s242_s17, %s2383_s22  ;;  %p2391_p13 = scmp.lt.s32.totalorder %s242_s17, %s242_s17 }
  0x22   : > { %p2392_p0 = scmp.lt.s32.totalorder %s2383_s22, %s2383_s22 }
  0x23   : > { %p2386_p1 = pnand %p2384_p10, %p2348_p12 }
  0x24   : > { %p2393_p4 = por %p2392_p0, %p2391_p13 }
  0x25   : > { %p2387_p6 = pneg %p2386_p1 }
  0x26   : > { %2267 = dma.hbm_to_vmem [thread:$0]  (!%p2619_p11), %s4457_s6, 128, %s268_s15, [#allocation6]  }
  0x27   : > { %p2394_p8 = pnand %p2393_p4, %p2387_p6 }
  0x29   : > { %2397 = shalt.err (!%p2394_p8)
}
  0x2a   : > { %s2502_s23 = smov 512   ;;  %s2503_s24 = smov 32  }
  0x2b   : > { %s4458_s0 = sld [smem:[#allocation107_spill]]  ;;  %s2642_s10 = sadd.s32 1, %s2498_s30  }
  0x2c   : > { %s53_s14 = sadd.s32 1, %s2494_s29  ;;  %s50_s15 = ssub.s32 %s2498_s30, %s2642_s10 }
  0x2d   : > { %p60_p1 = scmp.ne.s32.totalorder %s2494_s29, %s2490_s28  ;;  %p51_p2 = scmp.eq.s32.totalorder %s50_s15, 0 }
  0x2e   : > { %p61_p4 = scmp.eq.s32.totalorder %s2498_s30, 0  ;;  %p4459_p6 = scmp.eq.s32.totalorder %s2591_s9, 1 }
  0x2f   : > { %p2278_p9 = scmp.lt.s32.totalorder %s2498_s30, 2  ;;  %s281_s18 = sand.u32 1, %s2498_s30  }
  0x30   : > { %p2652_p8 = por %p4459_p6, %p60_p1  ;;  %p62_p12 = por %p61_p4, %p60_p1 }
  0x31   : > { %2264 = dma.hbm_to_vmem [thread:$0]  (!%p2619_p11), %s4458_s0, 2048, %s242_s17, [#allocation3], %s2502_s23, %s2502_s23, %s2503_s24  }
  0x32   : > { %s4460_s16 = scalar_select %p2652_p8, 1, 0 }
  0x33   : > { %s2658_s19 = scalar_select %p51_p2, %s2494_s29, %s53_s14  }
  0x34   : > { %s283_s20 = sand.u32 1, %s2494_s29   ;;  %s2247_s21 = sshll.u32 %s2498_s30, 9 }
  0x35   : > { %4461 = sst [smem:[#allocation13_spill]] %s2658_s19  ;;  %s2228_s17 = sshll.u32 %s283_s20, 5 }
  0x36   : > { %s2666_s24 = scalar_lea.hbm %s4325_s1, %s2247_s21  ;;  %s285_s25 = scalar_lea.vmem [#allocation5], %s2228_s17 }
  0x37   : > { %s293_s26 = sshll.u32 %s285_s25, 4  ;;  %p2668_p11 = pnand %p2278_p9, %p62_p12  ;;  %s294_s26 = int_to_ptr.vmem [resolvable:$true] %s293_s26 }
  0x38   : > { %s282_s14 = scalar_lea.sflag [#allocation6], %s281_s18  ;;  %s2398_s0 = scalar_lea.hbm %s2666_s24, 512 }
  0x39   : > { %p2399_p3 = scmp.ne.s32.totalorder %s2666_s24, %s2398_s0  ;;  %p2400_p5 = pneg %p2668_p11 }
  0x3a   : > { %s2403_s22 = scalar_lea.hbm %s4325_s1, 1024  ;;  %p2404_p13 = scmp.lt.s32.totalorder %s2666_s24, %s4325_s1 }
  0x3b   : > { %p2401_p7 = pnand %p2400_p5, %p2399_p3  ;;  %p2405_p0 = scmp.lt.s32.totalorder %s2403_s22, %s2398_s0 }
  0x3d   : > { %p2402_p10 = pneg %p2401_p7  ;;  %p2406_p1 = por %p2405_p0, %p2404_p13 }
  0x3f   : > { %p2407_p2 = pnand %p2406_p1, %p2402_p10 }
  0x41   : > { %2410 = shalt.err (!%p2407_p2)
}
  0x42   : > { %s2411_s25 = scalar_lea.vmem %s294_s26, 512  ;;  %s2504_s18 = smov [#allocation5]  }
  0x43   : > { %p2412_p4 = scmp.ne.s32.totalorder %s294_s26, %s2411_s25  ;;  %s2416_s6 = sshll.u32 %s2504_s18, 4  ;;  %s2417_s6 = int_to_ptr.vmem [resolvable:$false] %s2416_s6 }
  0x44   : > { %s2418_s19 = scalar_lea.vmem %s2417_s6, 1024  ;;  %p2419_p12 = scmp.lt.s32.totalorder %s294_s26, %s2417_s6 }
  0x45   : > { %p2414_p6 = pnand %p2412_p4, %p2400_p5  ;;  %p2420_p3 = scmp.lt.s32.totalorder %s2418_s19, %s2411_s25 }
  0x47   : > { %p2415_p9 = pneg %p2414_p6  ;;  %p2421_p7 = por %p2420_p3, %p2419_p12 }
  0x49   : > { %p2422_p8 = pnand %p2421_p7, %p2415_p9 }
  0x4b   : > { %2425 = shalt.err (!%p2422_p8)
}
  0x4c   : > { %2271 = dma.hbm_to_vmem [thread:$0]  (!%p2668_p11), %s2666_s24, 512, %s294_s26, %s282_s14  }
  0x4d   : > { %p4463_p10 = scmp.ne.s32.totalorder %s4455_s13, 0 }
  0x4f   : > { %302 = sbr.rel (%p4463_p10) target bundleno = 1363 (0x553), region = 52 }
  0x54   : > { %p4464_p13 = scmp.eq.s32.totalorder %s2591_s9, 0 }
  0x56   : > { %2469 = dma.done.wait (%p4464_p13), [#allocation3], 2048   ;;  %p4465_p5 = pmov %p4464_p13 }
  0x57   : > { %s308_s0 = sand.u32 1, %s2591_s9   ;;  %s4337_s6 = sand.u32 1, %s2490_s28  }
  0x58   : > { %2471 = vsyncadd (%p4465_p5), [#allocation3], 4294965248  ;;  %s2696_s19 = sshll.u32 %s4337_s6, 5  ;;  %s309_s24 = scalar_lea.sflag [#allocation6], %s308_s0 }
  0x59   : > { %s2699_s26 = scalar_lea.vmem [#allocation5], %s2696_s19  ;;  %p4466_p8 = scmp.ne.s32.totalorder %s4453_s11, 0 }
  0x5b   : > { %2473 = dma.done.wait (%p4466_p8), %s309_s24, 512  }
  0x5c   : > { %2475 = vsyncadd (%p4466_p8), %s309_s24, 4294966784  ;;  %p4467_p11 = pmov %p4465_p5 }
  0x5d   : > { %p4468_p0 = pmov %p4465_p5 }
  0x5e   : > { %2477 = dma.done.wait (%p4467_p11), [#allocation6], 128  }
  0x5f   : > { %2479 = vsyncadd (%p4468_p0), [#allocation6], 4294967168  ;;  %v2710_v0 = vld [vmem:[%s2699_s26 + $0x8] sm:$0xff]  ;;  %v2713_v1 = vld [vmem:[%s2699_s26] sm:$0xff]  ;;  %s2505_s13 = smov 121   ;;  %s2506_s11 = smov 127   ;;  %v363_v4 = vlaneseq }
  0x60   : > { %918 = vrot.lane.b32.xlu0 %v2710_v0, %s2505_s13  ;;  %916 = vrot.lane.b32.xlu1 %v2713_v1, %s2505_s13  ;;  %v2720_v2 = vld [vmem:[%s2699_s26 + $0x10] sm:$0xff]  ;;  %v2731_v3 = vld [vmem:[%s2699_s26 + $0x18] sm:$0xff]  ;;  %s2507_s15 = smov 1   ;;  %s2508_s14 = smov 7   ;;  %vm1285_vm2 = vcmask 719872   ;;  %v2522_v54 = vmov 0  }
  0x61   : > { %s2509_s20 = smov 8   ;;  %s2510_s21 = smov 9   ;;  %v373_v5 = vshrl.u32 %v363_v4, 7  ;;  %v2833_v6 = vand.u32 127, %v363_v4  ;;  %v354_v37 = vld [vmem:[%s4326_s2 + $0x8] sm:$0xff]  ;;  %2337 = vset.pattern.permute.xlu0 %v2522_v54  ;;  %v1279_v55 = vld [vmem:[%s4327_s3] sm:$0xff] }
  0x62   : > { %s2511_s22 = smov 55   ;;  %s2512_s23 = smov 56   ;;  %v930_v11 = vld [vmem:[#allocation2 + $0x27] ss:$8 sm:$0xf]  ;;  %2236 = vmatprep.mubr.msk.f32.mxu0 %vm1285_vm2, %v354_v37  ;;  %2237 = vmatprep.mubr.msk.f32.mxu1 %vm1285_vm2, %v354_v37 }
  0x63   : > { %s2513_s17 = smov 57   ;;  %s4338_s25 = smov 63   ;;  %v2839_v7 = vsub.s32 1, %v373_v5  ;;  %v2841_v8 = vsub.s32 0, %v373_v5  ;;  %vm924_vm0 = vcmp.lt.s32.totalorder %v2833_v6, 121  ;;  %v2856_v18 = vsub.s32 2, %v373_v5 }
  0x64   : > { %920 = vrot.lane.b32.xlu0 %v2720_v2, %s2505_s13  ;;  %878 = vrot.lane.b32.xlu1 %v2710_v0, %s2506_s11  ;;  %s2515_s18 = smov 64   ;;  %s4346_s0 = smov 65   ;;  %v890_v14 = vld [vmem:[#allocation2 + $0x26] ss:$8 sm:$0xf]  ;;  %v2858_v19 = vsub.s32 3, %v373_v5 }
  0x65   : > { %s4344_s24 = smov 71   ;;  %s4342_s6 = smov 72   ;;  %v2849_v12 = vrot.slane %v930_v11, %v2839_v7  ;;  %v2852_v13 = vrot.slane %v930_v11, %v2841_v8  ;;  %vm884_vm1 = vcmp.lt.s32.totalorder %v2833_v6, 127  ;;  %v2869_v22 = vrot.slane %v890_v14, %v2839_v7  ;;  %v2882_v30 = vld [vmem:[#allocation2 + $0x24] ss:$8 sm:$0xf] }
  0x66   : > { %v2872_v23 = vrot.slane %v890_v14, %v2841_v8  ;;  %v2880_v29 = vrot.slane %v930_v11, %v2858_v19  ;;  %v2891_v33 = vrot.slane %v930_v11, %v2856_v18  ;;  %v2895_v36 = vrot.slane %v2882_v30, %v2839_v7  ;;  %v810_v53 = vld [vmem:[#allocation2 + $0x23] ss:$8 sm:$0xf]  ;;  %v2952_v62 = vld [vmem:[#allocation2 + $0x22] ss:$8 sm:$0xf] }
  0x67   : > { %4469 = vst [vmem:[#allocation14_spill] sm:$0xff] %v2849_v12  ;;  %4470 = vst [vmem:[#allocation15_spill] sm:$0xff] %v2852_v13  ;;  %v2905_v40 = vrot.slane %v890_v14, %v2858_v19  ;;  %vm844_vm3 = vcmp.lt.s32.totalorder %v2833_v6, 1  ;;  %v2916_v43 = vrot.slane %v890_v14, %v2856_v18  ;;  %v2929_v49 = vrot.slane %v2882_v30, %v2841_v8  ;;  %p4691_p2 = scmp.ne.s32.totalorder %s4460_s16, 0 }
  0x68   : > { %880 = vrot.lane.b32.xlu0 %v2720_v2, %s2506_s11  ;;  %876 = vrot.lane.b32.xlu1 %v2713_v1, %s2506_s11  ;;  %4471 = vst [vmem:[#allocation16_spill] sm:$0xff] %v2869_v22  ;;  %4472 = vst [vmem:[#allocation17_spill] sm:$0xff] %v2872_v23  ;;  %vm804_vm4 = vcmp.lt.s32.totalorder %v2833_v6, 7  ;;  %v2946_v60 = vrot.slane %v810_v53, %v2839_v7  ;;  %v2949_v61 = vrot.slane %v810_v53, %v2841_v8 }
  0x69   : > { %4473 = vst [vmem:[#allocation18_spill] sm:$0xff] %v2880_v29  ;;  %4474 = vst [vmem:[#allocation19_spill] sm:$0xff] %v2891_v33  ;;  %vm764_vm5 = vcmp.lt.s32.totalorder %v2833_v6, 8  ;;  %vm724_vm6 = vcmp.lt.s32.totalorder %v2833_v6, 9  ;;  %vm684_vm7 = vcmp.lt.s32.totalorder %v2833_v6, 55  ;;  %vm644_vm8 = vcmp.lt.s32.totalorder %v2833_v6, 56 }
  0x6a   : > { %4475 = vst [vmem:[#allocation20_spill] sm:$0xff] %v2895_v36  ;;  %4476 = vst [vmem:[#allocation21_spill] sm:$0xff] %v2905_v40  ;;  %vm604_vm9 = vcmp.lt.s32.totalorder %v2833_v6, 57  ;;  %vm564_vm10 = vcmp.lt.s32.totalorder %v2833_v6, 63  ;;  %vm524_vm11 = vcmp.lt.s32.totalorder %v2833_v6, 64  ;;  %vm484_vm12 = vcmp.lt.s32.totalorder %v2833_v6, 65 }
  0x6b   : > { %4477 = vst [vmem:[#allocation22_spill] sm:$0xff] %v2916_v43  ;;  %4478 = vst [vmem:[#allocation23_spill] sm:$0xff] %v2929_v49  ;;  %vm444_vm13 = vcmp.lt.s32.totalorder %v2833_v6, 71  ;;  %vm4428_vm14 = vcmp.lt.s32.totalorder %v2833_v6, 72  ;;  %vm4427_vm15 = vcmp.lt.s32.totalorder %v2833_v6, 73 }
  0x6c   : > { %922 = vrot.lane.b32.xlu0 %v2731_v3, %s2505_s13  ;;  %836 = vrot.lane.b32.xlu1 %v2713_v1, %s2507_s15  ;;  %4479 = vst [vmem:[#allocation24_spill] sm:$0xff] %v2946_v60  ;;  %4480 = vst [vmem:[#allocation25_spill] sm:$0xff] %v2949_v61 }
  0x70   : > { %838 = vrot.lane.b32.xlu0 %v2710_v0, %s2507_s15  ;;  %882 = vrot.lane.b32.xlu1 %v2731_v3, %s2506_s11 }
  0x74   : > { %842 = vrot.lane.b32.xlu0 %v2731_v3, %s2507_s15  ;;  %796 = vrot.lane.b32.xlu1 %v2713_v1, %s2508_s14 }
  0x78   : > { %798 = vrot.lane.b32.xlu0 %v2710_v0, %s2508_s14  ;;  %802 = vrot.lane.b32.xlu1 %v2731_v3, %s2508_s14 }
  0x7c   : > { %756 = vrot.lane.b32.xlu0 %v2713_v1, %s2509_s20  ;;  %758 = vrot.lane.b32.xlu1 %v2710_v0, %s2509_s20 }
  0x80   : > { %840 = vrot.lane.b32.xlu0 %v2720_v2, %s2507_s15  ;;  %762 = vrot.lane.b32.xlu1 %v2731_v3, %s2509_s20 }
  0x84   : > { %716 = vrot.lane.b32.xlu0 %v2713_v1, %s2510_s21  ;;  %718 = vrot.lane.b32.xlu1 %v2710_v0, %s2510_s21 }
  0x88   : > { %800 = vrot.lane.b32.xlu0 %v2720_v2, %s2508_s14  ;;  %722 = vrot.lane.b32.xlu1 %v2731_v3, %s2510_s21 }
  0x8c   : > { %676 = vrot.lane.b32.xlu0 %v2713_v1, %s2511_s22  ;;  %678 = vrot.lane.b32.xlu1 %v2710_v0, %s2511_s22 }
  0x90   : > { %760 = vrot.lane.b32.xlu0 %v2720_v2, %s2509_s20  ;;  %682 = vrot.lane.b32.xlu1 %v2731_v3, %s2511_s22 }
  0x94   : > { %636 = vrot.lane.b32.xlu0 %v2713_v1, %s2512_s23  ;;  %638 = vrot.lane.b32.xlu1 %v2710_v0, %s2512_s23 }
  0x98   : > { %720 = vrot.lane.b32.xlu0 %v2720_v2, %s2510_s21  ;;  %642 = vrot.lane.b32.xlu1 %v2731_v3, %s2512_s23 }
  0x9c   : > { %596 = vrot.lane.b32.xlu0 %v2713_v1, %s2513_s17  ;;  %598 = vrot.lane.b32.xlu1 %v2710_v0, %s2513_s17 }
  0xa0   : > { %680 = vrot.lane.b32.xlu0 %v2720_v2, %s2511_s22  ;;  %602 = vrot.lane.b32.xlu1 %v2731_v3, %s2513_s17 }
  0xa4   : > { %556 = vrot.lane.b32.xlu0 %v2713_v1, %s4338_s25  ;;  %558 = vrot.lane.b32.xlu1 %v2710_v0, %s4338_s25 }
  0xa8   : > { %640 = vrot.lane.b32.xlu0 %v2720_v2, %s2512_s23  ;;  %562 = vrot.lane.b32.xlu1 %v2731_v3, %s4338_s25 }
  0xac   : > { %516 = vrot.lane.b32.xlu0 %v2713_v1, %s2515_s18  ;;  %518 = vrot.lane.b32.xlu1 %v2710_v0, %s2515_s18 }
  0xb0   : > { %600 = vrot.lane.b32.xlu0 %v2720_v2, %s2513_s17  ;;  %522 = vrot.lane.b32.xlu1 %v2731_v3, %s2515_s18 }
  0xb4   : > { %476 = vrot.lane.b32.xlu0 %v2713_v1, %s4346_s0  ;;  %478 = vrot.lane.b32.xlu1 %v2710_v0, %s4346_s0 }
  0xb8   : > { %560 = vrot.lane.b32.xlu0 %v2720_v2, %s4338_s25  ;;  %482 = vrot.lane.b32.xlu1 %v2731_v3, %s4346_s0  ;;  %s4340_s25 = smov 73  }
  0xbc   : > { %436 = vrot.lane.b32.xlu0 %v2713_v1, %s4344_s24  ;;  %438 = vrot.lane.b32.xlu1 %v2710_v0, %s4344_s24 }
  0xc0   : > { %520 = vrot.lane.b32.xlu0 %v2720_v2, %s2515_s18  ;;  %442 = vrot.lane.b32.xlu1 %v2731_v3, %s4344_s24 }
  0xc4   : > { %396 = vrot.lane.b32.xlu0 %v2713_v1, %s4342_s6  ;;  %398 = vrot.lane.b32.xlu1 %v2710_v0, %s4342_s6 }
  0xc8   : > { %480 = vrot.lane.b32.xlu0 %v2720_v2, %s4346_s0  ;;  %402 = vrot.lane.b32.xlu1 %v2731_v3, %s4342_s6  ;;  %s2248_s0 = sshll.u32 %s2591_s9, 9  ;;  %s4690_s9 = sand.u32 1, %s2490_s28  }
  0xcc   : > { %355 = vrot.lane.b32.xlu0 %v2713_v1, %s4340_s25  ;;  %357 = vrot.lane.b32.xlu1 %v2710_v0, %s4340_s25 }
  0xd0   : > { %440 = vrot.lane.b32.xlu0 %v2720_v2, %s4344_s24  ;;  %361 = vrot.lane.b32.xlu1 %v2731_v3, %s4340_s25  ;;  %s348_s24 = scalar_lea.vmem [#allocation8], %s2696_s19  ;;  %s2118_s19 = scalar_lea.sflag [#allocation4], %s4690_s9 }
  0xd2   : > { %v919_v9 = vpop.permute.xlu0 %918  ;;  %v917_v10 = vpop.permute.xlu1 %916 }
  0xd3   : > { %v927_v17 = vsel %vm924_vm0, %v917_v10, %v919_v9 }
  0xd4   : > { %400 = vrot.lane.b32.xlu0 %v2720_v2, %s4342_s6  ;;  %359 = vrot.lane.b32.xlu1 %v2720_v2, %s4340_s25  ;;  %s2520_s25 = smov 119   ;;  %v952_v24 = vmul.f32 %v2852_v13, %v927_v17  ;;  %s2521_s6 = smov 120   ;;  %v2979_v17 = vrot.slane %v2882_v30, %v2856_v18 }
  0xd6   : > { %v921_v15 = vpop.permute.xlu0 %920  ;;  %v879_v16 = vpop.permute.xlu1 %878  ;;  %4484 = vst [vmem:[#allocation29_spill] sm:$0xff] %v2979_v17 }
  0xd7   : > { %v926_v20 = vsel %vm924_vm0, %v919_v9, %v921_v15  ;;  %v2964_v9 = vrot.slane %v2952_v62, %v2839_v7 }
  0xd8   : > { %998 = vrot.lane.b32.xlu0 %v2710_v0, %s2520_s25  ;;  %v953_v21 = vmul.f32 %v2849_v12, %v926_v20  ;;  %1000 = vrot.lane.b32.xlu1 %v2720_v2, %s2520_s25  ;;  %v2981_v20 = vld [vmem:[#allocation2 + $0x21] ss:$8 sm:$0xf]  ;;  %v1091_v12 = vld [vmem:[#allocation2 + $0x44] ss:$8 sm:$0xf] }
  0xd9   : > { %4481 = vst [vmem:[#allocation26_spill] sm:$0xff] %v2964_v9 }
  0xda   : > { %1289 = vmatprep.subr.mxu0 %v953_v21  ;;  %v881_v25 = vpop.permute.xlu0 %880  ;;  %v877_v26 = vpop.permute.xlu1 %876 }
  0xdb   : > { %v886_v27 = vsel %vm884_vm1, %v879_v16, %v881_v25  ;;  %v887_v28 = vsel %vm884_vm1, %v877_v26, %v879_v16  ;;  %1290 = vmatpush1.msra.mxu0 %v952_v24  ;;  %v2975_v16 = vrot.slane %v2882_v30, %v2858_v19 }
  0xdc   : > { %996 = vrot.lane.b32.xlu0 %v2713_v1, %s2520_s25  ;;  %958 = vrot.lane.b32.xlu1 %v2710_v0, %s2521_s6  ;;  %v913_v31 = vmul.f32 %v2869_v22, %v886_v27  ;;  %v912_v32 = vmul.f32 %v2872_v23, %v887_v28  ;;  %v1118_v23 = vld [vmem:[#allocation2 + $0x45] ss:$8 sm:$0xf] }
  0xdd   : > { %4483 = vst [vmem:[#allocation28_spill] sm:$0xff] %v2975_v16 }
  0xde   : > { %v923_v34 = vpop.permute.xlu0 %922  ;;  %1291 = vmatprep.subr.mxu0 %v913_v31  ;;  %v837_v35 = vpop.permute.xlu1 %836 }
  0xdf   : > { %1292 = vmatpush1.msra.mxu0 %v912_v32  ;;  %v928_v38 = vsel %vm924_vm0, %v923_v34, %v917_v10  ;;  %v925_v39 = vsel %vm924_vm0, %v921_v15, %v923_v34  ;;  %v2971_v15 = vrot.slane %v2952_v62, %v2841_v8  ;;  %v2995_v32 = vrot.slane %v2981_v20, %v2839_v7 }
  0xe0   : > { %960 = vrot.lane.b32.xlu0 %v2720_v2, %s2521_s6  ;;  %956 = vrot.lane.b32.xlu1 %v2713_v1, %s2521_s6  ;;  %v955_v41 = vmul.f32 %v2880_v29, %v928_v38  ;;  %v954_v42 = vmul.f32 %v2891_v33, %v925_v39  ;;  %v3002_v39 = vrot.slane %v2981_v20, %v2841_v8 }
  0xe1   : > { %1293 = vmatprep.subr.mxu0 %v2710_v0  ;;  %4482 = vst [vmem:[#allocation27_spill] sm:$0xff] %v2971_v15  ;;  %4485 = vst [vmem:[#allocation30_spill] sm:$0xff] %v2995_v32 }
  0xe2   : > { %v839_v44 = vpop.permute.xlu0 %838  ;;  %1360 = vmatprep.subr.mxu1 %v955_v41  ;;  %v883_v45 = vpop.permute.xlu1 %882  ;;  %1294 = vmatpush1.msra.mxu0 %v2713_v1  ;;  %4486 = vst [vmem:[#allocation31_spill] sm:$0xff] %v3002_v39  ;;  %v3005_v41 = vrot.slane %v810_v53, %v2858_v19 }
  0xe3   : > { %v847_v46 = vsel %vm844_vm3, %v837_v35, %v839_v44  ;;  %v885_v47 = vsel %vm884_vm1, %v881_v25, %v883_v45  ;;  %v888_v48 = vsel %vm884_vm1, %v883_v45, %v877_v26  ;;  %1361 = vmatpush1.msra.mxu1 %v954_v42  ;;  %v3008_v42 = vrot.slane %v810_v53, %v2856_v18 }
  0xe4   : > { %1002 = vrot.lane.b32.xlu0 %v2731_v3, %s2520_s25  ;;  %962 = vrot.lane.b32.xlu1 %v2731_v3, %s2521_s6  ;;  %v873_v50 = vmul.f32 %v2895_v36, %v847_v46  ;;  %v915_v51 = vmul.f32 %v2905_v40, %v888_v48  ;;  %v914_v52 = vmul.f32 %v2916_v43, %v885_v47  ;;  %v1145_v43 = vld [vmem:[#allocation2 + $0x46] ss:$8 sm:$0xf] }
  0xe5   : > { %4487 = vst [vmem:[#allocation32_spill] sm:$0xff] %v3005_v41  ;;  %4488 = vst [vmem:[#allocation33_spill] sm:$0xff] %v3008_v42 }
  0xe6   : > { %v843_v56 = vpop.permute.xlu0 %842  ;;  %1295 = vmatprep.subr.mxu0 %v873_v50  ;;  %1362 = vmatprep.subr.mxu1 %v915_v51  ;;  %v797_v57 = vpop.permute.xlu1 %796 }
  0xe7   : > { %v848_v58 = vsel %vm844_vm3, %v843_v56, %v837_v35  ;;  %1363 = vmatpush1.msra.mxu1 %v914_v52 }
  0xe8   : > { %v872_v59 = vmul.f32 %v2929_v49, %v848_v58  ;;  %1364 = vmatprep.subr.mxu1 %v2731_v3  ;;  %1282 = vperm.xlu0 %2337, %v1279_v55  }
  0xe9   : > { %1365 = vmatpush1.msra.mxu1 %v2720_v2 }
  0xea   : > { %v799_v63 = vpop.permute.xlu0 %798  ;;  %1296 = vmatpush1.msra.mxu0 %v872_v59  ;;  %v803_v0 = vpop.permute.xlu1 %802 }
  0xeb   : > { %v807_v1 = vsel %vm804_vm4, %v797_v57, %v799_v63  ;;  %v808_v4 = vsel %vm804_vm4, %v803_v0, %v797_v57 }
  0xec   : > { %v833_v5 = vmul.f32 %v2946_v60, %v807_v1  ;;  %v832_v3 = vmul.f32 %v2949_v61, %v808_v4  ;;  %v3044_v1 = vld [vmem:[#allocation2 + $0x7] ss:$8 sm:$0xf]  ;;  %v1199_v61 = vld [vmem:[#allocation2 + $0x60] ss:$8 sm:$0xf] }
  0xed   : > { %v1172_v60 = vld [vmem:[#allocation2 + $0x47] ss:$8 sm:$0xf]  ;;  %v3390_v49 = vrot.slane %v1199_v61, %v2841_v8  ;;  %v3405_v13 = vrot.slane %v1199_v61, %v2858_v19 }
  0xee   : > { %v757_v2 = vpop.permute.xlu0 %756  ;;  %1297 = vmatprep.subr.mxu0 %v833_v5  ;;  %v759_v10 = vpop.permute.xlu1 %758  ;;  %v3399_v33 = vrot.slane %v1172_v60, %v2841_v8 }
  0xef   : > { %v767_v11 = vsel %vm764_vm5, %v757_v2, %v759_v10  ;;  %1298 = vmatpush1.msra.mxu0 %v832_v3 }
  0xf0   : > { %v793_v14 = vmul.f32 %v2964_v9, %v767_v11 }
  0xf2   : > { %v841_v21 = vpop.permute.xlu0 %840  ;;  %1299 = vmatprep.subr.mxu0 %v793_v14  ;;  %v763_v24 = vpop.permute.xlu1 %762 }
  0xf3   : > { %v845_v25 = vsel %vm844_vm3, %v841_v21, %v843_v56  ;;  %v846_v26 = vsel %vm844_vm3, %v839_v44, %v841_v21  ;;  %v768_v27 = vsel %vm764_vm5, %v763_v24, %v757_v2  ;;  %v3010_v44 = vld [vmem:[#allocation2 + $0x20] ss:$8 sm:$0xf] }
  0xf4   : > { %v792_v28 = vmul.f32 %v2971_v15, %v768_v27  ;;  %v875_v30 = vmul.f32 %v2975_v16, %v845_v25  ;;  %v874_v31 = vmul.f32 %v2979_v17, %v846_v26  ;;  %v3024_v54 = vrot.slane %v3010_v44, %v2839_v7 }
  0xf5   : > { %v3034_v59 = vrot.slane %v3010_v44, %v2841_v8  ;;  %v3061_v25 = vrot.slane %v3044_v1, %v2839_v7 }
  0xf6   : > { %v717_v34 = vpop.permute.xlu0 %716  ;;  %1300 = vmatpush1.msra.mxu0 %v792_v28  ;;  %1366 = vmatprep.subr.mxu1 %v875_v30  ;;  %v719_v35 = vpop.permute.xlu1 %718  ;;  %4489 = vst [vmem:[#allocation34_spill] sm:$0xff] %v3024_v54  ;;  %v3071_v28 = vrot.slane %v3044_v1, %v2841_v8  ;;  %v3075_v30 = vrot.slane %v2981_v20, %v2858_v19 }
  0xf7   : > { %v727_v37 = vsel %vm724_vm6, %v717_v34, %v719_v35  ;;  %1367 = vmatpush1.msra.mxu1 %v874_v31  ;;  %4490 = vst [vmem:[#allocation35_spill] sm:$0xff] %v3034_v59  ;;  %4493 = vst [vmem:[#allocation38_spill] sm:$0xff] %v3061_v25  ;;  %v3079_v31 = vrot.slane %v2981_v20, %v2856_v18 }
  0xf8   : > { %v753_v38 = vmul.f32 %v2995_v32, %v727_v37  ;;  %4494 = vst [vmem:[#allocation39_spill] sm:$0xff] %v3071_v28  ;;  %4495 = vst [vmem:[#allocation40_spill] sm:$0xff] %v3075_v30 }
  0xf9   : > { %4496 = vst [vmem:[#allocation41_spill] sm:$0xff] %v3079_v31 }
  0xfa   : > { %v801_v45 = vpop.permute.xlu0 %800  ;;  %1301 = vmatprep.subr.mxu0 %v753_v38  ;;  %v723_v46 = vpop.permute.xlu1 %722 }
  0xfb   : > { %v805_v47 = vsel %vm804_vm4, %v801_v45, %v803_v0  ;;  %v806_v48 = vsel %vm804_vm4, %v799_v63, %v801_v45  ;;  %v728_v50 = vsel %vm724_vm6, %v723_v46, %v717_v34  ;;  %v3038_v63 = vrot.slane %v2952_v62, %v2858_v19  ;;  %v3081_v34 = vld [vmem:[#allocation2 + $0x6] ss:$8 sm:$0xf] }
  0xfc   : > { %v752_v51 = vmul.f32 %v3002_v39, %v728_v50  ;;  %v835_v52 = vmul.f32 %v3005_v41, %v805_v47  ;;  %v834_v53 = vmul.f32 %v3008_v42, %v806_v48  ;;  %v3042_v0 = vrot.slane %v2952_v62, %v2856_v18 }
  0xfd   : > { %4491 = vst [vmem:[#allocation36_spill] sm:$0xff] %v3038_v63 }
  0xfe   : > { %v677_v55 = vpop.permute.xlu0 %676  ;;  %1302 = vmatpush1.msra.mxu0 %v752_v51  ;;  %1368 = vmatprep.subr.mxu1 %v835_v52  ;;  %v679_v56 = vpop.permute.xlu1 %678  ;;  %4492 = vst [vmem:[#allocation37_spill] sm:$0xff] %v3042_v0  ;;  %v3098_v52 = vrot.slane %v3081_v34, %v2839_v7 }
  0xff   : > { %v3028_v57 = vsel %vm684_vm7, %v677_v55, %v679_v56  ;;  %1369 = vmatpush1.msra.mxu1 %v834_v53 }
 0x100   : > { %v713_v58 = vmul.f32 %v3024_v54, %v3028_v57  ;;  %4497 = vst [vmem:[#allocation42_spill] sm:$0xff] %v3098_v52 }
 0x102   : > { %v761_v4 = vpop.permute.xlu0 %760  ;;  %1303 = vmatprep.subr.mxu0 %v713_v58  ;;  %v683_v5 = vpop.permute.xlu1 %682  ;;  %v3108_v58 = vrot.slane %v3081_v34, %v2841_v8 }
 0x103   : > { %v765_v3 = vsel %vm764_vm5, %v761_v4, %v763_v24  ;;  %v766_v2 = vsel %vm764_vm5, %v759_v10, %v761_v4  ;;  %v3052_v11 = vsel %vm684_vm7, %v683_v5, %v677_v55  ;;  %v3112_v4 = vrot.slane %v3010_v44, %v2858_v19 }
 0x104   : > { %v712_v62 = vmul.f32 %v3034_v59, %v3052_v11  ;;  %v795_v14 = vmul.f32 %v3038_v63, %v765_v3  ;;  %v794_v21 = vmul.f32 %v3042_v0, %v766_v2  ;;  %4498 = vst [vmem:[#allocation43_spill] sm:$0xff] %v3108_v58  ;;  %v3116_v3 = vrot.slane %v3010_v44, %v2856_v18  ;;  %v3118_v2 = vld [vmem:[#allocation2 + $0x5] ss:$8 sm:$0xf] }
 0x105   : > { %4499 = vst [vmem:[#allocation44_spill] sm:$0xff] %v3112_v4 }
 0x106   : > { %v637_v24 = vpop.permute.xlu0 %636  ;;  %1304 = vmatpush1.msra.mxu0 %v712_v62  ;;  %1370 = vmatprep.subr.mxu1 %v795_v14  ;;  %v639_v10 = vpop.permute.xlu1 %638  ;;  %4500 = vst [vmem:[#allocation45_spill] sm:$0xff] %v3116_v3 }
 0x107   : > { %v3065_v26 = vsel %vm644_vm8, %v637_v24, %v639_v10  ;;  %1371 = vmatpush1.msra.mxu1 %v794_v21 }
 0x108   : > { %v673_v27 = vmul.f32 %v3061_v25, %v3065_v26 }
 0x10a   : > { %v721_v37 = vpop.permute.xlu0 %720  ;;  %1305 = vmatprep.subr.mxu0 %v673_v27  ;;  %v643_v38 = vpop.permute.xlu1 %642 }
 0x10b   : > { %v725_v45 = vsel %vm724_vm6, %v721_v37, %v723_v46  ;;  %v726_v47 = vsel %vm724_vm6, %v719_v35, %v721_v37  ;;  %v3089_v48 = vsel %vm644_vm8, %v643_v38, %v637_v24 }
 0x10c   : > { %v672_v20 = vmul.f32 %v3071_v28, %v3089_v48  ;;  %v755_v50 = vmul.f32 %v3075_v30, %v725_v45  ;;  %v754_v51 = vmul.f32 %v3079_v31, %v726_v47  ;;  %v3141_v45 = vrot.slane %v3118_v2, %v2839_v7 }
 0x10e   : > { %v597_v46 = vpop.permute.xlu0 %596  ;;  %1306 = vmatpush1.msra.mxu0 %v672_v20  ;;  %1372 = vmatprep.subr.mxu1 %v755_v50  ;;  %v599_v35 = vpop.permute.xlu1 %598  ;;  %4501 = vst [vmem:[#allocation46_spill] sm:$0xff] %v3141_v45 }
 0x10f   : > { %v3102_v53 = vsel %vm604_vm9, %v597_v46, %v599_v35  ;;  %1373 = vmatpush1.msra.mxu1 %v754_v51  ;;  %v3151_v51 = vrot.slane %v3118_v2, %v2841_v8 }
 0x110   : > { %v633_v55 = vmul.f32 %v3098_v52, %v3102_v53 }
 0x111   : > { %4502 = vst [vmem:[#allocation47_spill] sm:$0xff] %v3151_v51 }
 0x112   : > { %v681_v62 = vpop.permute.xlu0 %680  ;;  %1307 = vmatprep.subr.mxu0 %v633_v55  ;;  %v603_v14 = vpop.permute.xlu1 %602  ;;  %v3159_v55 = vrot.slane %v3044_v1, %v2856_v18 }
 0x113   : > { %v3122_v21 = vsel %vm684_vm7, %v681_v62, %v683_v5  ;;  %v3126_v24 = vsel %vm684_vm7, %v679_v56, %v681_v62  ;;  %v3130_v27 = vsel %vm604_vm9, %v603_v14, %v597_v46  ;;  %v3155_v46 = vrot.slane %v3044_v1, %v2858_v19  ;;  %v3161_v62 = vld [vmem:[#allocation2 + $0x4] ss:$8 sm:$0xf] }
 0x114   : > { %v632_v44 = vmul.f32 %v3108_v58, %v3130_v27  ;;  %v715_v37 = vmul.f32 %v3112_v4, %v3122_v21  ;;  %v714_v5 = vmul.f32 %v3116_v3, %v3126_v24  ;;  %4504 = vst [vmem:[#allocation49_spill] sm:$0xff] %v3159_v55  ;;  %v3184_v52 = vrot.slane %v3161_v62, %v2839_v7 }
 0x115   : > { %4503 = vst [vmem:[#allocation48_spill] sm:$0xff] %v3155_v46 }
 0x116   : > { %v557_v56 = vpop.permute.xlu0 %556  ;;  %1308 = vmatpush1.msra.mxu0 %v632_v44  ;;  %1374 = vmatprep.subr.mxu1 %v715_v37  ;;  %v559_v47 = vpop.permute.xlu1 %558  ;;  %4505 = vst [vmem:[#allocation50_spill] sm:$0xff] %v3184_v52 }
 0x117   : > { %v3145_v20 = vsel %vm564_vm10, %v557_v56, %v559_v47  ;;  %1375 = vmatpush1.msra.mxu1 %v714_v5 }
 0x118   : > { %v593_v50 = vmul.f32 %v3141_v45, %v3145_v20 }
 0x11a   : > { %v641_v44 = vpop.permute.xlu0 %640  ;;  %1309 = vmatprep.subr.mxu0 %v593_v50  ;;  %v563_v37 = vpop.permute.xlu1 %562 }
 0x11b   : > { %v3165_v5 = vsel %vm644_vm8, %v641_v44, %v643_v38  ;;  %v3169_v45 = vsel %vm644_vm8, %v639_v10, %v641_v44  ;;  %v3173_v58 = vsel %vm564_vm10, %v563_v37, %v557_v56 }
 0x11c   : > { %v592_v1 = vmul.f32 %v3151_v51, %v3173_v58  ;;  %v675_v50 = vmul.f32 %v3155_v46, %v3165_v5  ;;  %v674_v38 = vmul.f32 %v3159_v55, %v3169_v45  ;;  %v3194_v46 = vrot.slane %v3161_v62, %v2841_v8 }
 0x11d   : > { %v3198_v55 = vrot.slane %v3081_v34, %v2858_v19 }
 0x11e   : > { %v517_v10 = vpop.permute.xlu0 %516  ;;  %1310 = vmatpush1.msra.mxu0 %v592_v1  ;;  %1376 = vmatprep.subr.mxu1 %v675_v50  ;;  %v519_v56 = vpop.permute.xlu1 %518  ;;  %4506 = vst [vmem:[#allocation51_spill] sm:$0xff] %v3194_v46  ;;  %v3202_v1 = vrot.slane %v3081_v34, %v2856_v18  ;;  %v3204_v50 = vld [vmem:[#allocation2 + $0x3] ss:$8 sm:$0xf] }
 0x11f   : > { %v3188_v44 = vsel %vm524_vm11, %v517_v10, %v519_v56  ;;  %1377 = vmatpush1.msra.mxu1 %v674_v38  ;;  %4507 = vst [vmem:[#allocation52_spill] sm:$0xff] %v3198_v55  ;;  %v3227_v25 = vrot.slane %v3204_v50, %v2839_v7  ;;  %v3335_v41 = vrot.slane %v3204_v50, %v2856_v18 }
 0x120   : > { %v553_v51 = vmul.f32 %v3184_v52, %v3188_v44  ;;  %4508 = vst [vmem:[#allocation53_spill] sm:$0xff] %v3202_v1 }
 0x121   : > { %4510 = vst [vmem:[#allocation55_spill] sm:$0xff] %v3227_v25  ;;  %4525 = vst [vmem:[#allocation70_spill] sm:$0xff] %v3335_v41 }
 0x122   : > { %v601_v28 = vpop.permute.xlu0 %600  ;;  %1311 = vmatprep.subr.mxu0 %v553_v51  ;;  %v523_v38 = vpop.permute.xlu1 %522 }
 0x123   : > { %v3208_v52 = vsel %vm604_vm9, %v601_v28, %v603_v14  ;;  %v3212_v4 = vsel %vm604_vm9, %v599_v35, %v601_v28  ;;  %v3216_v3 = vsel %vm524_vm11, %v523_v38, %v517_v10 }
 0x124   : > { %4509 = vst [vmem:[#allocation54_spill] sm:$0xff] %v3216_v3  ;;  %v552_v34 = vmul.f32 %v3194_v46, %v3216_v3  ;;  %v635_v51 = vmul.f32 %v3198_v55, %v3208_v52  ;;  %v634_v14 = vmul.f32 %v3202_v1, %v3212_v4  ;;  %v3240_v55 = vrot.slane %v3204_v50, %v2841_v8 }
 0x125   : > { %v3244_v1 = vrot.slane %v3118_v2, %v2858_v19 }
 0x126   : > { %v477_v28 = vpop.permute.xlu0 %476  ;;  %1312 = vmatpush1.msra.mxu0 %v552_v34  ;;  %1378 = vmatprep.subr.mxu1 %v635_v51  ;;  %v3229_v35 = vpop.permute.xlu1 %478  ;;  %4511 = vst [vmem:[#allocation56_spill] sm:$0xff] %v3240_v55  ;;  %v3248_v34 = vrot.slane %v3118_v2, %v2856_v18  ;;  %v3250_v51 = vld [vmem:[#allocation2 + $0x2] ss:$8 sm:$0xf] }
 0x127   : > { %v3234_v10 = vsel %vm484_vm12, %v477_v28, %v3229_v35  ;;  %1379 = vmatpush1.msra.mxu1 %v634_v14  ;;  %4512 = vst [vmem:[#allocation57_spill] sm:$0xff] %v3244_v1 }
 0x128   : > { %v513_v46 = vmul.f32 %v3227_v25, %v3234_v10  ;;  %4513 = vst [vmem:[#allocation58_spill] sm:$0xff] %v3248_v34 }
 0x12a   : > { %v561_v59 = vpop.permute.xlu0 %560  ;;  %1313 = vmatprep.subr.mxu0 %v513_v46  ;;  %v483_v14 = vpop.permute.xlu1 %482 }
 0x12b   : > { %v3254_v25 = vsel %vm564_vm10, %v561_v59, %v563_v37  ;;  %v3258_v30 = vsel %vm564_vm10, %v559_v47, %v561_v59  ;;  %v3262_v31 = vsel %vm484_vm12, %v483_v14, %v477_v28  ;;  %v3271_v37 = vrot.slane %v3250_v51, %v2839_v7 }
 0x12c   : > { %4514 = vst [vmem:[#allocation59_spill] sm:$0xff] %v3254_v25  ;;  %4515 = vst [vmem:[#allocation60_spill] sm:$0xff] %v3262_v31  ;;  %v512_v2 = vmul.f32 %v3240_v55, %v3262_v31  ;;  %v595_v46 = vmul.f32 %v3244_v1, %v3254_v25  ;;  %v594_v59 = vmul.f32 %v3248_v34, %v3258_v30  ;;  %v1064_v31 = vld [vmem:[#allocation2 + $0x43] ss:$8 sm:$0xf] }
 0x12d   : > { %4516 = vst [vmem:[#allocation61_spill] sm:$0xff] %v3271_v37  ;;  %v3286_v1 = vrot.slane %v3161_v62, %v2856_v18  ;;  %v3290_v34 = vrot.slane %v3161_v62, %v2858_v19  ;;  %v3453_v25 = vrot.slane %v1172_v60, %v2856_v18 }
 0x12e   : > { %v437_v47 = vpop.permute.xlu0 %436  ;;  %1314 = vmatpush1.msra.mxu0 %v512_v2  ;;  %1380 = vmatprep.subr.mxu1 %v595_v46  ;;  %v3275_v28 = vpop.permute.xlu1 %438  ;;  %v3294_v2 = vrot.slane %v3250_v51, %v2841_v8  ;;  %v3296_v46 = vld [vmem:[#allocation2 + $0x1] ss:$8 sm:$0xf] }
 0x12f   : > { %v3280_v54 = vsel %vm444_vm13, %v437_v47, %v3275_v28  ;;  %1381 = vmatpush1.msra.mxu1 %v594_v59  ;;  %4518 = vst [vmem:[#allocation63_spill] sm:$0xff] %v3286_v1  ;;  %4519 = vst [vmem:[#allocation64_spill] sm:$0xff] %v3290_v34 }
 0x130   : > { %4517 = vst [vmem:[#allocation62_spill] sm:$0xff] %v3280_v54  ;;  %v473_v55 = vmul.f32 %v3271_v37, %v3280_v54  ;;  %4520 = vst [vmem:[#allocation65_spill] sm:$0xff] %v3294_v2  ;;  %v3450_v54 = vrot.slane %v1172_v60, %v2839_v7 }
 0x131   : > { %4542 = vst [vmem:[#allocation87_spill] sm:$0xff] %v3453_v25  ;;  %v3479_v25 = vrot.slane %v3296_v46, %v2856_v18 }
 0x132   : > { %v521_v39 = vpop.permute.xlu0 %520  ;;  %1315 = vmatprep.subr.mxu0 %v473_v55  ;;  %v3298_v59 = vpop.permute.xlu1 %442 }
 0x133   : > { %v3302_v37 = vsel %vm524_vm11, %v521_v39, %v523_v38  ;;  %v3306_v63 = vsel %vm524_vm11, %v519_v56, %v521_v39  ;;  %v3311_v62 = vsel %vm444_vm13, %v3298_v59, %v437_v47  ;;  %v3320_v38 = vrot.slane %v3296_v46, %v2839_v7 }
 0x134   : > { %4521 = vst [vmem:[#allocation66_spill] sm:$0xff] %v3302_v37  ;;  %4522 = vst [vmem:[#allocation67_spill] sm:$0xff] %v3311_v62  ;;  %v554_v0 = vmul.f32 %v3286_v1, %v3306_v63  ;;  %v555_v55 = vmul.f32 %v3290_v34, %v3302_v37  ;;  %v472_v39 = vmul.f32 %v3294_v2, %v3311_v62  ;;  %v1253_v34 = vld [vmem:[#allocation2 + $0x62] ss:$8 sm:$0xf] }
 0x135   : > { %4523 = vst [vmem:[#allocation68_spill] sm:$0xff] %v3320_v38  ;;  %v1226_v1 = vld [vmem:[#allocation2 + $0x61] ss:$8 sm:$0xf]  ;;  %v3421_v62 = vrot.slane %v3250_v51, %v2858_v19  ;;  %v3444_v37 = vrot.slane %v1118_v23, %v2858_v19 }
 0x136   : > { %v397_v56 = vpop.permute.xlu0 %396  ;;  %1382 = vmatprep.subr.mxu1 %v555_v55  ;;  %v3324_v32 = vpop.permute.xlu1 %398  ;;  %1316 = vmatpush1.msra.mxu0 %v472_v39  ;;  %v3339_v55 = vrot.slane %v3204_v50, %v2858_v19  ;;  %v3343_v39 = vrot.slane %v3296_v46, %v2841_v8  ;;  %v3345_v2 = vld [vmem:[#allocation2] ss:$8 sm:$0xf]  ;;  %v3353_v9 = vrot.slane %v1226_v1, %v2841_v8 }
 0x137   : > { %v3329_v47 = vsel %vm4428_vm14, %v397_v56, %v3324_v32  ;;  %1383 = vmatpush1.msra.mxu1 %v554_v0  ;;  %v3356_v50 = vrot.slane %v1253_v34, %v2858_v19  ;;  %v3373_v40 = vrot.slane %v1226_v1, %v2858_v19  ;;  %v3396_v29 = vrot.slane %v1226_v1, %v2839_v7 }
 0x138   : > { %4524 = vst [vmem:[#allocation69_spill] sm:$0xff] %v3329_v47  ;;  %v433_v15 = vmul.f32 %v3320_v38, %v3329_v47  ;;  %4526 = vst [vmem:[#allocation71_spill] sm:$0xff] %v3339_v55  ;;  %v3350_v38 = vrot.slane %v1253_v34, %v2841_v8  ;;  %v3435_v47 = vrot.slane %v3345_v2, %v2841_v8 }
 0x139   : > { %4527 = vst [vmem:[#allocation72_spill] sm:$0xff] %v3343_v39  ;;  %4535 = vst [vmem:[#allocation80_spill] sm:$0xff] %v3421_v62 }
 0x13a   : > { %v481_v0 = vpop.permute.xlu0 %480  ;;  %1317 = vmatprep.subr.mxu0 %v433_v15  ;;  %v3347_v42 = vpop.permute.xlu1 %402  ;;  %4528 = vst [vmem:[#allocation73_spill] sm:$0xff] %v3350_v38  ;;  %4537 = vst [vmem:[#allocation82_spill] sm:$0xff] %v3435_v47 }
 0x13b   : > { %v3360_v16 = vsel %vm484_vm12, %v481_v0, %v483_v14  ;;  %v3365_v15 = vsel %vm484_vm12, %v3229_v35, %v481_v0  ;;  %v3370_v17 = vsel %vm4428_vm14, %v3347_v42, %v397_v56  ;;  %v3382_v35 = vrot.slane %v3345_v2, %v2839_v7  ;;  %4540 = vst [vmem:[#allocation85_spill] sm:$0xff] %v3444_v37 }
 0x13c   : > { %4529 = vst [vmem:[#allocation74_spill] sm:$0xff] %v3360_v16  ;;  %4530 = vst [vmem:[#allocation75_spill] sm:$0xff] %v3370_v17  ;;  %v514_v36 = vmul.f32 %v3335_v41, %v3365_v15  ;;  %v515_v14 = vmul.f32 %v3339_v55, %v3360_v16  ;;  %v432_v56 = vmul.f32 %v3343_v39, %v3370_v17 }
 0x13d   : > { %4531 = vst [vmem:[#allocation76_spill] sm:$0xff] %v3382_v35  ;;  %v3387_v0 = vrot.slane %v1253_v34, %v2839_v7  ;;  %v3393_v41 = vrot.slane %v1253_v34, %v2856_v18  ;;  %v3402_v39 = vrot.slane %v1226_v1, %v2856_v18  ;;  %v3415_v17 = vrot.slane %v1172_v60, %v2858_v19 }
 0x13e   : > { %v356_v55 = vpop.permute.xlu0 %355  ;;  %1384 = vmatprep.subr.mxu1 %v515_v14  ;;  %v358_v22 = vpop.permute.xlu1 %357  ;;  %1318 = vmatpush1.msra.mxu0 %v432_v56  ;;  %v3412_v14 = vrot.slane %v1145_v43, %v2841_v8  ;;  %v3424_v56 = vrot.slane %v1199_v61, %v2839_v7  ;;  %v3427_v16 = vrot.slane %v1199_v61, %v2856_v18 }
 0x13f   : > { %4532 = vst [vmem:[#allocation77_spill] sm:$0xff] %v3387_v0  ;;  %v3409_v34 = vsel %vm4427_vm15, %v356_v55, %v358_v22  ;;  %1385 = vmatpush1.msra.mxu1 %v514_v36  ;;  %4534 = vst [vmem:[#allocation79_spill] sm:$0xff] %v3415_v17  ;;  %v3431_v36 = vrot.slane %v3250_v51, %v2856_v18  ;;  %v3447_v61 = vrot.slane %v1091_v12, %v2841_v8 }
 0x140   : > { %4533 = vst [vmem:[#allocation78_spill] sm:$0xff] %v3409_v34  ;;  %v393_v1 = vmul.f32 %v3382_v35, %v3409_v34  ;;  %v3438_v35 = vrot.slane %v1118_v23, %v2841_v8  ;;  %v3441_v34 = vrot.slane %v1145_v43, %v2858_v19  ;;  %v3456_v17 = vrot.slane %v1145_v43, %v2839_v7 }
 0x141   : > { %4536 = vst [vmem:[#allocation81_spill] sm:$0xff] %v3431_v36  ;;  %4541 = vst [vmem:[#allocation86_spill] sm:$0xff] %v3447_v61  ;;  %v3473_v60 = vrot.slane %v1145_v43, %v2856_v18 }
 0x142   : > { %4538 = vst [vmem:[#allocation83_spill] sm:$0xff] %v3438_v35  ;;  %4539 = vst [vmem:[#allocation84_spill] sm:$0xff] %v3441_v34  ;;  %v441_v3 = vpop.permute.xlu0 %440  ;;  %1319 = vmatprep.subr.mxu0 %v393_v1  ;;  %v362_v51 = vpop.permute.xlu1 %361 }
 0x143   : > { %v3461_v37 = vsel %vm444_vm13, %v441_v3, %v3298_v59  ;;  %v3466_v34 = vsel %vm444_vm13, %v3275_v28, %v441_v3  ;;  %v3470_v1 = vsel %vm4427_vm15, %v362_v51, %v356_v55  ;;  %4545 = vst [vmem:[#allocation90_spill] sm:$0xff] %v3473_v60  ;;  %v3483_v59 = vrot.slane %v3296_v46, %v2858_v19  ;;  %v1037_v46 = vld [vmem:[#allocation2 + $0x42] ss:$8 sm:$0xf] }
 0x144   : > { %4543 = vst [vmem:[#allocation88_spill] sm:$0xff] %v3461_v37  ;;  %4544 = vst [vmem:[#allocation89_spill] sm:$0xff] %v3470_v1  ;;  %v475_v61 = vmul.f32 %v3421_v62, %v3461_v37  ;;  %v3486_v3 = vrot.slane %v1091_v12, %v2858_v19  ;;  %v3489_v28 = vrot.slane %v1064_v31, %v2841_v8 }
 0x145   : > { %v474_v43 = vmul.f32 %v3431_v36, %v3466_v34  ;;  %v392_v55 = vmul.f32 %v3435_v47, %v3470_v1  ;;  %v3496_v62 = vrot.slane %v1118_v23, %v2839_v7  ;;  %v3499_v37 = vrot.slane %v1118_v23, %v2856_v18 }
 0x146   : > { %4546 = vst [vmem:[#allocation91_spill] sm:$0xff] %v3486_v3  ;;  %4547 = vst [vmem:[#allocation92_spill] sm:$0xff] %v3489_v28  ;;  %v401_v60 = vpop.permute.xlu0 %400  ;;  %1386 = vmatprep.subr.mxu1 %v475_v61  ;;  %v3503_v3 = vrot.slane %v3345_v2, %v2858_v19  ;;  %v360_v28 = vpop.permute.xlu1 %359  ;;  %v1276_v36 = vmul.f32 %v3387_v0, %v3126_v24  ;;  %v3519_v61 = vrot.slane %v3345_v2, %v2856_v18 }
 0x147   : > { %v3510_v47 = vsel %vm4428_vm14, %v401_v60, %v3347_v42  ;;  %v3515_v23 = vsel %vm4428_vm14, %v3324_v32, %v401_v60  ;;  %1320 = vmatpush1.msra.mxu0 %v392_v55  ;;  %v3523_v1 = vsel %vm4427_vm15, %v360_v28, %v362_v51  ;;  %v3531_v0 = vsel %vm4427_vm15, %v358_v22, %v360_v28 }
 0x148   : > { %4548 = vst [vmem:[#allocation93_spill] sm:$0xff] %v3503_v3  ;;  %v434_v24 = vmul.f32 %v3479_v25, %v3515_v23  ;;  %v435_v42 = vmul.f32 %v3483_v59, %v3510_v47  ;;  %1331 = vmatprep.subr.mxu0 %v1276_v36  ;;  %v1275_v32 = vmul.f32 %v3350_v38, %v3028_v57  ;;  %vm1004_vm15 = vcmp.lt.s32.totalorder %v2833_v6, 119 }
 0x149   : > { %v3536_v2 = vrot.slane %v1064_v31, %v2858_v19  ;;  %v3539_v51 = vrot.slane %v1037_v46, %v2841_v8  ;;  %v3542_v60 = vrot.slane %v1091_v12, %v2839_v7  ;;  %1387 = vmatpush1.msra.mxu1 %v474_v43  ;;  %v1249_v55 = vmul.f32 %v3396_v29, %v3169_v45 }
 0x14a   : > { %v3547_v22 = vrot.slane %v1091_v12, %v2856_v18  ;;  %v395_v36 = vmul.f32 %v3503_v3, %v3523_v1  ;;  %1332 = vmatpush2.msra.mxu0 %v1275_v32  ;;  %v3551_v57 = vpop.permute.xlu0 %998  ;;  %v1248_v28 = vmul.f32 %v3353_v9, %v3065_v26  ;;  %1388 = vmatprep.subr.mxu1 %v435_v42  ;;  %v3555_v38 = vpop.permute.xlu1 %1000  ;;  %vm964_vm14 = vcmp.lt.s32.totalorder %v2833_v6, 120 }
 0x14b   : > { %4549 = vst [vmem:[#allocation94_spill] sm:$0xff] %v3536_v2  ;;  %4550 = vst [vmem:[#allocation95_spill] sm:$0xff] %v3539_v51  ;;  %v3558_v43 = vrot.slane %v1037_v46, %v2858_v19  ;;  %v394_v45 = vmul.f32 %v3519_v61, %v3531_v0  ;;  %1333 = vmatprep.subr.mxu0 %v1249_v55  ;;  %v1222_v12 = vmul.f32 %v3424_v56, %v3212_v4  ;;  %v3574_v55 = vld [vmem:[#allocation2 + $0x41] ss:$8 sm:$0xf] }
 0x14c   : > { %4551 = vst [vmem:[#allocation96_spill] sm:$0xff] %v3542_v60  ;;  %4552 = vst [vmem:[#allocation97_spill] sm:$0xff] %v3547_v22  ;;  %1389 = vmatpush1.msra.mxu1 %v434_v24  ;;  %v3565_v32 = vrot.slane %v1064_v31, %v2839_v7  ;;  %1334 = vmatpush2.msra.mxu0 %v1248_v28  ;;  %v1221_v26 = vmul.f32 %v3390_v49, %v3102_v53 }
 0x14d   : > { %4553 = vst [vmem:[#allocation98_spill] sm:$0xff] %v3558_v43  ;;  %1390 = vmatprep.subr.mxu1 %v395_v36  ;;  %v1278_v42 = vmul.f32 %v3356_v50, %v3052_v11  ;;  %v3572_v3 = vrot.slane %v1064_v31, %v2856_v18  ;;  %1335 = vmatprep.subr.mxu0 %v1222_v12  ;;  %v3596_v12 = vld [vmem:[#allocation2 + $0x40] ss:$8 sm:$0xf] }
 0x14e   : > { %4554 = vst [vmem:[#allocation99_spill] sm:$0xff] %v3565_v32  ;;  %v1195_v4 = vmul.f32 %v3450_v54, %v3258_v30  ;;  %1391 = vmatpush1.msra.mxu1 %v394_v45  ;;  %v1277_v24 = vmul.f32 %v3393_v41, %v3122_v21  ;;  %v3581_v28 = vrot.slane %v1037_v46, %v2839_v7  ;;  %v3583_v53 = vpop.permute.xlu0 %996  ;;  %v959_v21 = vpop.permute.xlu1 %958 }
 0x14f   : > { %4555 = vst [vmem:[#allocation100_spill] sm:$0xff] %v3572_v3  ;;  %1336 = vmatpush2.msra.mxu0 %v1221_v26  ;;  %v1194_v11 = vmul.f32 %v3399_v33, %v3145_v20  ;;  %1402 = vmatprep.subr.mxu1 %v1278_v42  ;;  %v1251_v31 = vmul.f32 %v3373_v40, %v3089_v48  ;;  %v4561_v42 = vld [vmem:[#allocation79_spill] sm:$0xff] }
 0x150   : > { %4556 = vst [vmem:[#allocation101_spill] sm:$0xff] %v3581_v28  ;;  %v1168_v30 = vmul.f32 %v3456_v17, %v3306_v63  ;;  %v3592_v36 = vrot.slane %v1037_v46, %v2856_v18  ;;  %1337 = vmatprep.subr.mxu0 %v1195_v4  ;;  %1403 = vmatpush2.msra.mxu1 %v1277_v24 }
 0x151   : > { %v1250_v45 = vmul.f32 %v3402_v39, %v3165_v5  ;;  %v3600_v20 = vrot.slane %v3574_v55, %v2839_v7  ;;  %1338 = vmatpush2.msra.mxu0 %v1194_v11  ;;  %v1167_v48 = vmul.f32 %v3412_v14, %v3188_v44  ;;  %1404 = vmatprep.subr.mxu1 %v1251_v31  ;;  %v4564_v11 = vld [vmem:[#allocation87_spill] sm:$0xff] }
 0x152   : > { %4557 = vst [vmem:[#allocation102_spill] sm:$0xff] %v3592_v36  ;;  %v1224_v63 = vmul.f32 %v3405_v13, %v3130_v27  ;;  %v1141_v46 = vmul.f32 %v3496_v62, %v3365_v15  ;;  %v3610_v5 = vrot.slane %v3574_v55, %v2841_v8  ;;  %1339 = vmatprep.subr.mxu0 %v1168_v30  ;;  %v3619_v27 = vpop.permute.xlu0 %960  ;;  %v4565_v30 = vld [vmem:[#allocation62_spill] sm:$0xff] }
 0x153   : > { %4558 = vst [vmem:[#allocation103_spill] sm:$0xff] %v3600_v20  ;;  %1405 = vmatpush2.msra.mxu1 %v1250_v45  ;;  %v1223_v26 = vmul.f32 %v3427_v16, %v3208_v52  ;;  %1340 = vmatpush2.msra.mxu0 %v1167_v48  ;;  %v3617_v44 = vrot.slane %v3596_v12, %v2839_v7  ;;  %v4563_v52 = vld [vmem:[#allocation59_spill] sm:$0xff]  ;;  %v4569_v48 = vld [vmem:[#allocation84_spill] sm:$0xff] }
 0x154   : > { %4559 = vst [vmem:[#allocation104_spill] sm:$0xff] %v3610_v5  ;;  %v1140_v15 = vmul.f32 %v3438_v35, %v3234_v10  ;;  %1406 = vmatprep.subr.mxu1 %v1224_v63  ;;  %v1197_v4 = vmul.f32 %v4561_v42, %v3173_v58  ;;  %v1114_v24 = vmul.f32 %v3542_v60, %v3466_v34  ;;  %v4566_v10 = vld [vmem:[#allocation86_spill] sm:$0xff] }
 0x155   : > { %4560 = vst [vmem:[#allocation105_spill] sm:$0xff] %v3617_v44  ;;  %1341 = vmatprep.subr.mxu0 %v1141_v46  ;;  %1407 = vmatpush2.msra.mxu1 %v1223_v26  ;;  %v3630_v7 = vrot.slane %v3596_v12, %v2841_v8  ;;  %v1196_v31 = vmul.f32 %v4564_v11, %v4563_v52  ;;  %v4568_v34 = vld [vmem:[#allocation54_spill] sm:$0xff]  ;;  %v4570_v46 = vld [vmem:[#allocation60_spill] sm:$0xff]  ;;  %v4571_v26 = vld [vmem:[#allocation85_spill] sm:$0xff] }
 0x156   : > { %v1113_v45 = vmul.f32 %v4566_v10, %v4565_v30  ;;  %1342 = vmatpush2.msra.mxu0 %v1140_v15  ;;  %1408 = vmatprep.subr.mxu1 %v1197_v4  ;;  %v3638_v58 = vrot.slane %v3574_v55, %v2856_v18  ;;  %v1170_v63 = vmul.f32 %v4569_v48, %v4568_v34  ;;  %v4572_v8 = vld [vmem:[#allocation66_spill] sm:$0xff]  ;;  %v957_v30 = vpop.permute.xlu1 %956  ;;  %v4574_v15 = vld [vmem:[#allocation69_spill] sm:$0xff]  ;;  %v4575_v4 = vld [vmem:[#allocation92_spill] sm:$0xff] }
 0x157   : > { %4562 = vst [vmem:[#allocation106_spill] sm:$0xff] %v3630_v7  ;;  %v1143_v60 = vmul.f32 %v4571_v26, %v4570_v46  ;;  %v4573_v35 = vld [vmem:[#allocation90_spill] sm:$0xff]  ;;  %v1087_v52 = vmul.f32 %v3565_v32, %v3515_v23  ;;  %1343 = vmatprep.subr.mxu0 %v1114_v24  ;;  %1409 = vmatpush2.msra.mxu1 %v1196_v31 }
 0x158   : > { %4567 = vst [vmem:[#allocation59_spill] sm:$0xff] %v3638_v58  ;;  %v1169_v42 = vmul.f32 %v4573_v35, %v4572_v8  ;;  %v1086_v10 = vmul.f32 %v4575_v4, %v4574_v15  ;;  %v1006_v34 = vsel %vm1004_vm15, %v3551_v57, %v3555_v38  ;;  %v966_v46 = vsel %vm964_vm14, %v959_v21, %v3619_v27  ;;  %v4576_v8 = vld [vmem:[#allocation74_spill] sm:$0xff]  ;;  %v4577_v15 = vld [vmem:[#allocation67_spill] sm:$0xff] }
 0x159   : > { %1344 = vmatpush2.msra.mxu0 %v1113_v45  ;;  %1410 = vmatprep.subr.mxu1 %v1170_v63  ;;  %v1142_v23 = vmul.f32 %v3499_v37, %v4576_v8  ;;  %v1060_v24 = vmul.f32 %v3581_v28, %v3531_v0  ;;  %v1007_v31 = vsel %vm1004_vm15, %v3583_v53, %v3551_v57  ;;  %v4578_v4 = vld [vmem:[#allocation91_spill] sm:$0xff]  ;;  %v4579_v32 = vld [vmem:[#allocation78_spill] sm:$0xff]  ;;  %v4580_v63 = vld [vmem:[#allocation88_spill] sm:$0xff]  ;;  %v1003_v8 = vpop.permute.xlu0 %1002 }
 0x15a   : > { %1345 = vmatprep.subr.mxu0 %v1087_v52  ;;  %1411 = vmatpush2.msra.mxu1 %v1169_v42  ;;  %v1116_v26 = vmul.f32 %v4578_v4, %v4577_v15  ;;  %v1059_v45 = vmul.f32 %v3539_v51, %v4579_v32  ;;  %v1115_v35 = vmul.f32 %v3547_v22, %v4580_v63  ;;  %v4581_v42 = vld [vmem:[#allocation75_spill] sm:$0xff] }
 0x15b   : > { %1346 = vmatpush2.msra.mxu0 %v1086_v10  ;;  %1412 = vmatprep.subr.mxu1 %v1143_v60  ;;  %v1033_v0 = vmul.f32 %v3600_v20, %v1006_v34  ;;  %v993_v28 = vmul.f32 %v3617_v44, %v966_v46  ;;  %v967_v57 = vsel %vm964_vm14, %v957_v30, %v959_v21  ;;  %v963_v34 = vpop.permute.xlu1 %962  ;;  %v4584_v46 = vld [vmem:[#allocation89_spill] sm:$0xff] }
 0x15c   : > { %1347 = vmatprep.subr.mxu0 %v1060_v24  ;;  %1413 = vmatpush2.msra.mxu1 %v1142_v23  ;;  %v1089_v52 = vmul.f32 %v3536_v2, %v4581_v42  ;;  %v1032_v32 = vmul.f32 %v3610_v5, %v1007_v31  ;;  %v3680_v15 = vrot.slane %v3574_v55, %v2858_v19  ;;  %v4641_v2 = vld [vmem:[#allocation71_spill] sm:$0xff] }
 0x15d   : > { %1348 = vmatpush2.msra.mxu0 %v1059_v45  ;;  %1414 = vmatprep.subr.mxu1 %v1116_v26  ;;  %v1088_v60 = vmul.f32 %v3572_v3, %v3510_v47  ;;  %v1008_v21 = vsel %vm1004_vm15, %v1003_v8, %v3583_v53  ;;  %v3689_v10 = vrot.slane %v3596_v12, %v2858_v19  ;;  %v353_v53 = vld [vmem:[%s4326_s2] sm:$0xff] }
 0x15e   : > { %4582 = vst [vmem:[#allocation87_spill] sm:$0xff] %v3680_v15  ;;  %1349 = vmatprep.subr.mxu0 %v1033_v0  ;;  %1415 = vmatpush2.msra.mxu1 %v1115_v35  ;;  %v1062_v55 = vmul.f32 %v3558_v43, %v4584_v46  ;;  %v992_v23 = vmul.f32 %v3630_v7, %v967_v57  ;;  %v4635_v43 = vld [vmem:[#allocation64_spill] sm:$0xff] }
 0x15f   : > { %4583 = vst [vmem:[#allocation62_spill] sm:$0xff] %v3689_v10  ;;  %v1005_v47 = vsel %vm1004_vm15, %v3555_v38, %v1003_v8  ;;  %1350 = vmatpush2.msra.mxu0 %v1032_v32  ;;  %1416 = vmatprep.subr.mxu1 %v1089_v52  ;;  %v1061_v19 = vmul.f32 %v3592_v36, %v3523_v1 }
 0x160   : > { %v3704_v35 = vrot.slane %v3596_v12, %v2856_v18  ;;  %v968_v26 = vsel %vm964_vm14, %v963_v34, %v957_v30  ;;  %1351 = vmatprep.subr.mxu0 %v993_v28  ;;  %1417 = vmatpush2.msra.mxu1 %v1088_v60  ;;  %v1035_v38 = vmul.f32 %v3680_v15, %v1008_v21 }
 0x161   : > { %v965_v24 = vsel %vm964_vm14, %v3619_v27, %v963_v34  ;;  %1352 = vmatpush2.msra.mxu0 %v992_v23  ;;  %1418 = vmatprep.subr.mxu1 %v1062_v55  ;;  %v1034_v31 = vmul.f32 %v3638_v58, %v1005_v47  ;;  %v995_v18 = vmul.f32 %v3689_v10, %v968_v26  ;;  %v4631_v58 = vld [vmem:[#allocation57_spill] sm:$0xff] }
 0x162   : > { %4585 = vst [vmem:[#allocation54_spill] sm:$0xff] %v3704_v35  ;;  %1354 = vmatmul.mubr.f32.vlgmr.msra.gmra.mxu0 %v353_v53  ;;  %1419 = vmatpush2.msra.mxu1 %v1061_v19  ;;  %v994_v1 = vmul.f32 %v3704_v35, %v965_v24 }
 0x163   : > { %1420 = vmatprep.subr.mxu1 %v1035_v38  ;;  %v1283_v28 = vpop.permute.xlu0 %1282 }
 0x164   : > { %1421 = vmatpush2.msra.mxu1 %v1034_v31 }
 0x165   : > { %1422 = vmatprep.subr.mxu1 %v995_v18 }
 0x166   : > { %1423 = vmatpush2.msra.mxu1 %v994_v1 }
 0x167   : > { %1425 = vmatmul.mubr.f32.vlgmr.msra.gmra.mxu1 %v353_v53 }
 0x222   : > { %v1355_v12 = vpop.f32.mrf.mxu0 }
 0x223   : > { %v1356_v30 = vadd.f32 %v1355_v12, %v1283_v28 }
 0x224   : > { %v1357_v45 = vpop.f32.mrf.mxu0 }
 0x225   : > { %v1358_v27 = vadd.f32 %v1357_v45, %v1283_v28  ;;  %v1437_v63 = vmul.f32 %v1356_v30, %v1356_v30 }
 0x227   : > { %v1438_v8 = vmul.f32 %v1358_v27, %v1358_v27  ;;  %v1426_v0 = vpop.f32.mrf.mxu1  ;;  %v1431_v57 = vadd.f32 %v1358_v27, %v1356_v30 }
 0x228   : > { %v1427_v42 = vadd.f32 %v1426_v0, %v1283_v28 }
 0x229   : > { %v1428_v52 = vpop.f32.mrf.mxu1  ;;  %v1441_v34 = vadd.f32 %v1438_v8, %v1437_v63 }
 0x22a   : > { %v1439_v32 = vmul.f32 %v1427_v42, %v1427_v42  ;;  %v1429_v60 = vadd.f32 %v1428_v52, %v1283_v28  ;;  %v1432_v21 = vadd.f32 %v1431_v57, %v1427_v42 }
 0x22c   : > { %v1433_v46 = vadd.f32 %v1432_v21, %v1429_v60  ;;  %v1440_v55 = vmul.f32 %v1429_v60, %v1429_v60  ;;  %v1442_v23 = vadd.f32 %v1441_v34, %v1439_v32 }
 0x22e   : > { %1434 = vadd.xlane.f32.xlu1 %v1433_v46  ;;  %v1443_v47 = vadd.f32 %v1442_v23, %v1440_v55  ;;  %v4591_v46 = vld [vmem:[#allocation14_spill] sm:$0xff] }
 0x230   : > { %1444 = vadd.xlane.f32.xlu0 %v1443_v47 }
 0x2b7   : > { %v1435_v53 = vpop.xlane.xlu1 %1434 }
 0x2b8   : > { %v1436_v19 = vmul.f32 0.001953125, %v1435_v53 }
 0x2b9   : > { %v1445_v26 = vpop.xlane.xlu0 %1444 }
 0x2ba   : > { %v1446_v38 = vmul.f32 0.001953125, %v1445_v26  ;;  %v1447_v24 = vmul.f32 %v1436_v19, %v1436_v19  ;;  %v1450_v1 = vsub.f32 %v1358_v27, %v1436_v19  ;;  %v1451_v12 = vsub.f32 %v1427_v42, %v1436_v19 }
 0x2bb   : > { %v1449_v28 = vsub.f32 %v1356_v30, %v1436_v19  ;;  %v1452_v32 = vsub.f32 %v1429_v60, %v1436_v19  ;;  %v4592_v19 = vld [vmem:[#allocation15_spill] sm:$0xff] }
 0x2bc   : > { %v1448_v31 = vsub.f32 %v1446_v38, %v1447_v24 }
 0x2be   : > { %v1453_v18 = vadd.f32 1e-05, %v1448_v31 }
 0x2c0   : > { %2338 = vrsqrt.f32 %v1453_v18 }
 0x2cd   : > { %v2339_v45 = vpop.eup %2338 }
 0x2ce   : > { %v1456_v0 = vmul.f32 %v2339_v45, %v1450_v1  ;;  %v1457_v63 = vmul.f32 %v2339_v45, %v1451_v12  ;;  %v1455_v8 = vmul.f32 %v2339_v45, %v1449_v28  ;;  %v1458_v21 = vmul.f32 %v2339_v45, %v1452_v32  ;;  %v4593_v12 = vld [vmem:[#allocation19_spill] sm:$0xff]  ;;  %v4594_v28 = vld [vmem:[#allocation18_spill] sm:$0xff] }
 0x2d0   : > { %v3715_v57 = vmax.f32 %v1456_v0, 0.0  ;;  %v3717_v52 = vmax.f32 %v1457_v63, 0.0  ;;  %v3723_v34 = vmax.f32 %v1455_v8, 0.0  ;;  %v3729_v30 = vmax.f32 %v1458_v21, 0.0  ;;  %v4595_v63 = vld [vmem:[#allocation16_spill] sm:$0xff] }
 0x2d2   : > { %1693 = vrot.lane.b32.xlu0 %v3717_v52, %s2505_s13  ;;  %1691 = vrot.lane.b32.xlu1 %v3715_v57, %s2505_s13 }
 0x2d6   : > { %1677 = vrot.lane.b32.xlu0 %v3717_v52, %s2506_s11  ;;  %1689 = vrot.lane.b32.xlu1 %v3723_v34, %s2505_s13 }
 0x2da   : > { %1695 = vrot.lane.b32.xlu0 %v3729_v30, %s2505_s13  ;;  %1675 = vrot.lane.b32.xlu1 %v3715_v57, %s2506_s11  ;;  %s4586_s13 = smov 63  }
 0x2de   : > { %1659 = vrot.lane.b32.xlu0 %v3715_v57, %s2507_s15  ;;  %1673 = vrot.lane.b32.xlu1 %v3723_v34, %s2506_s11 }
 0x2e2   : > { %1663 = vrot.lane.b32.xlu0 %v3729_v30, %s2507_s15  ;;  %1657 = vrot.lane.b32.xlu1 %v3723_v34, %s2507_s15 }
 0x2e6   : > { %1643 = vrot.lane.b32.xlu0 %v3715_v57, %s2508_s14  ;;  %1679 = vrot.lane.b32.xlu1 %v3729_v30, %s2506_s11  ;;  %s4587_s11 = smov 65  }
 0x2ea   : > { %1625 = vrot.lane.b32.xlu0 %v3723_v34, %s2509_s20  ;;  %1641 = vrot.lane.b32.xlu1 %v3723_v34, %s2508_s14 }
 0x2ee   : > { %1661 = vrot.lane.b32.xlu0 %v3717_v52, %s2507_s15  ;;  %1647 = vrot.lane.b32.xlu1 %v3729_v30, %s2508_s14  ;;  %s4588_s15 = smov 71  }
 0x2f2   : > { %1609 = vrot.lane.b32.xlu0 %v3723_v34, %s2510_s21  ;;  %1627 = vrot.lane.b32.xlu1 %v3715_v57, %s2509_s20 }
 0x2f6   : > { %1645 = vrot.lane.b32.xlu0 %v3717_v52, %s2508_s14  ;;  %1631 = vrot.lane.b32.xlu1 %v3729_v30, %s2509_s20  ;;  %s4589_s14 = smov 72  }
 0x2fa   : > { %1593 = vrot.lane.b32.xlu0 %v3723_v34, %s2511_s22  ;;  %1611 = vrot.lane.b32.xlu1 %v3715_v57, %s2510_s21 }
 0x2fe   : > { %1629 = vrot.lane.b32.xlu0 %v3717_v52, %s2509_s20  ;;  %1615 = vrot.lane.b32.xlu1 %v3729_v30, %s2510_s21  ;;  %s4590_s20 = smov 73  }
 0x302   : > { %1577 = vrot.lane.b32.xlu0 %v3723_v34, %s2512_s23  ;;  %1595 = vrot.lane.b32.xlu1 %v3715_v57, %s2511_s22 }
 0x306   : > { %1613 = vrot.lane.b32.xlu0 %v3717_v52, %s2510_s21  ;;  %1599 = vrot.lane.b32.xlu1 %v3729_v30, %s2511_s22  ;;  %s2524_s21 = smov [#allocation8]  }
 0x30a   : > { %1561 = vrot.lane.b32.xlu0 %v3723_v34, %s2513_s17  ;;  %1579 = vrot.lane.b32.xlu1 %v3715_v57, %s2512_s23 }
 0x30e   : > { %1597 = vrot.lane.b32.xlu0 %v3717_v52, %s2511_s22  ;;  %1583 = vrot.lane.b32.xlu1 %v3729_v30, %s2512_s23  ;;  %s2430_s22 = sshll.u32 %s2524_s21, 4  ;;  %s2431_s22 = int_to_ptr.vmem [resolvable:$false] %s2430_s22 }
 0x312   : > { %1545 = vrot.lane.b32.xlu0 %v3723_v34, %s4586_s13  ;;  %1563 = vrot.lane.b32.xlu1 %v3715_v57, %s2513_s17 }
 0x316   : > { %1581 = vrot.lane.b32.xlu0 %v3717_v52, %s2512_s23  ;;  %1567 = vrot.lane.b32.xlu1 %v3729_v30, %s2513_s17  ;;  %s2432_s23 = scalar_lea.vmem %s2431_s22, 1024 }
 0x31a   : > { %1529 = vrot.lane.b32.xlu0 %v3723_v34, %s2515_s18  ;;  %1547 = vrot.lane.b32.xlu1 %v3715_v57, %s4586_s13 }
 0x31e   : > { %1565 = vrot.lane.b32.xlu0 %v3717_v52, %s2513_s17  ;;  %1551 = vrot.lane.b32.xlu1 %v3729_v30, %s4586_s13 }
 0x322   : > { %1513 = vrot.lane.b32.xlu0 %v3723_v34, %s4587_s11  ;;  %1531 = vrot.lane.b32.xlu1 %v3715_v57, %s2515_s18 }
 0x326   : > { %1549 = vrot.lane.b32.xlu0 %v3717_v52, %s4586_s13  ;;  %1535 = vrot.lane.b32.xlu1 %v3729_v30, %s2515_s18  ;;  %s2132_s13 = sshll.u32 %s348_s24, 4  ;;  %s4282_s13 = int_to_ptr.vmem [resolvable:$true] %s2132_s13 }
 0x327   : > { %p2433_p9 = scmp.lt.s32.totalorder %s4282_s13, %s2431_s22 }
 0x32a   : > { %1497 = vrot.lane.b32.xlu0 %v3723_v34, %s4588_s15  ;;  %1515 = vrot.lane.b32.xlu1 %v3715_v57, %s4587_s11 }
 0x32e   : > { %1533 = vrot.lane.b32.xlu0 %v3717_v52, %s2515_s18  ;;  %1519 = vrot.lane.b32.xlu1 %v3729_v30, %s4587_s11 }
 0x332   : > { %1481 = vrot.lane.b32.xlu0 %v3723_v34, %s4589_s14  ;;  %1499 = vrot.lane.b32.xlu1 %v3715_v57, %s4588_s15 }
 0x336   : > { %1517 = vrot.lane.b32.xlu0 %v3717_v52, %s4587_s11  ;;  %1503 = vrot.lane.b32.xlu1 %v3729_v30, %s4588_s15 }
 0x33a   : > { %1465 = vrot.lane.b32.xlu0 %v3723_v34, %s4590_s20  ;;  %1483 = vrot.lane.b32.xlu1 %v3715_v57, %s4589_s14 }
 0x33e   : > { %1501 = vrot.lane.b32.xlu0 %v3717_v52, %s4588_s15  ;;  %1487 = vrot.lane.b32.xlu1 %v3729_v30, %s4589_s14 }
 0x342   : > { %1485 = vrot.lane.b32.xlu0 %v3717_v52, %s4589_s14  ;;  %1467 = vrot.lane.b32.xlu1 %v3715_v57, %s4590_s20  ;;  %s4280_s14 = scalar_lea.hbm %s4332_s8, %s2248_s0 }
 0x344   : > { %v1694_v27 = vpop.permute.xlu0 %1693  ;;  %v1692_v42 = vpop.permute.xlu1 %1691 }
 0x345   : > { %v1698_v60 = vsel %vm924_vm0, %v1692_v42, %v1694_v27 }
 0x346   : > { %v1702_v55 = vmul.f32 %v1698_v60, %v4591_v46  ;;  %1723 = vrot.lane.b32.xlu0 %v3715_v57, %s2520_s25  ;;  %1471 = vrot.lane.b32.xlu1 %v3729_v30, %s4590_s20  ;;  %v1464_v46 = vld [vmem:[%s4328_s4 + $0x8] sm:$0xff] }
 0x347   : > { %2238 = vmatprep.mubr.msk.f32.mxu0 %vm1285_vm2, %v1464_v46  ;;  %2239 = vmatprep.mubr.msk.f32.mxu1 %vm1285_vm2, %v1464_v46 }
 0x348   : > { %v1678_v23 = vpop.permute.xlu0 %1677  ;;  %1782 = vmatprep.subr.mxu0 %v1702_v55  ;;  %v1690_v47 = vpop.permute.xlu1 %1689  ;;  %v1773_v55 = vld [vmem:[%s4329_s5] sm:$0xff] }
 0x349   : > { %v1699_v53 = vsel %vm924_vm0, %v1690_v47, %v1692_v42  ;;  %v4596_v42 = vld [vmem:[#allocation17_spill] sm:$0xff] }
 0x34a   : > { %v1701_v26 = vmul.f32 %v1699_v53, %v4592_v19  ;;  %1721 = vrot.lane.b32.xlu0 %v3723_v34, %s2520_s25  ;;  %1469 = vrot.lane.b32.xlu1 %v3717_v52, %s4590_s20  ;;  %s2426_s20 = scalar_lea.vmem %s4282_s13, 512 }
 0x34b   : > { %p2427_p1 = scmp.ne.s32.totalorder %s4282_s13, %s2426_s20  ;;  %p2434_p12 = scmp.lt.s32.totalorder %s2432_s23, %s2426_s20 }
 0x34c   : > { %v1696_v38 = vpop.permute.xlu0 %1695  ;;  %1783 = vmatpush1.msra.mxu0 %v1701_v26  ;;  %v1676_v24 = vpop.permute.xlu1 %1675 }
 0x34d   : > { %v1697_v31 = vsel %vm924_vm0, %v1694_v27, %v1696_v38  ;;  %v1700_v18 = vsel %vm924_vm0, %v1696_v38, %v1690_v47  ;;  %v1682_v1 = vsel %vm884_vm1, %v1676_v24, %v1678_v23  ;;  %v4597_v38 = vld [vmem:[#allocation23_spill] sm:$0xff]  ;;  %vm4643_vm0 = vcmp.lt.s32.totalorder %v2833_v6, 72  ;;  %p2428_p4 = pnand %p2427_p1, %p4691_p2  ;;  %p2435_p3 = por %p2434_p12, %p2433_p9 }
 0x34e   : > { %v1703_v45 = vmul.f32 %v1697_v31, %v4593_v12  ;;  %v1704_v0 = vmul.f32 %v1700_v18, %v4594_v28  ;;  %v1686_v8 = vmul.f32 %v1682_v1, %v4595_v63  ;;  %1709 = vrot.lane.b32.xlu0 %v3717_v52, %s2521_s6  ;;  %1725 = vrot.lane.b32.xlu1 %v3717_v52, %s2520_s25  ;;  %v4598_v31 = vld [vmem:[#allocation20_spill] sm:$0xff]  ;;  %v4600_v63 = vld [vmem:[#allocation21_spill] sm:$0xff]  ;;  %vm4650_vm2 = vmmov %vm4643_vm0 }
 0x34f   : > { %p2429_p6 = pneg %p2428_p4 }
 0x350   : > { %v1660_v32 = vpop.permute.xlu0 %1659  ;;  %1784 = vmatprep.subr.mxu0 %v1686_v8  ;;  %1853 = vmatprep.subr.mxu1 %v1704_v0  ;;  %v1674_v21 = vpop.permute.xlu1 %1673 }
 0x351   : > { %v1683_v27 = vsel %vm884_vm1, %v1674_v21, %v1676_v24  ;;  %1854 = vmatpush1.msra.mxu1 %v1703_v45  ;;  %p2436_p7 = pnand %p2435_p3, %p2429_p6 }
 0x352   : > { %v1685_v60 = vmul.f32 %v1683_v27, %v4596_v42  ;;  %1727 = vrot.lane.b32.xlu0 %v3729_v30, %s2520_s25  ;;  %1707 = vrot.lane.b32.xlu1 %v3715_v57, %s2521_s6 }
 0x354   : > { %v1664_v47 = vpop.permute.xlu0 %1663  ;;  %1785 = vmatpush1.msra.mxu0 %v1685_v60  ;;  %v1658_v53 = vpop.permute.xlu1 %1657  ;;  %v4601_v60 = vld [vmem:[#allocation24_spill] sm:$0xff] }
 0x355   : > { %v1667_v19 = vsel %vm844_vm3, %v1658_v53, %v1660_v32  ;;  %v1668_v26 = vsel %vm844_vm3, %v1664_v47, %v1658_v53  ;;  %1786 = vmatprep.subr.mxu0 %v3715_v57  ;;  %v4599_v57 = vld [vmem:[#allocation22_spill] sm:$0xff] }
 0x356   : > { %v1669_v24 = vmul.f32 %v1668_v26, %v4597_v38  ;;  %v1670_v18 = vmul.f32 %v1667_v19, %v4598_v31  ;;  %1776 = vperm.xlu0 %2337, %v1773_v55   ;;  %1705 = vrot.lane.b32.xlu1 %v3723_v34, %s2521_s6  ;;  %v4602_v26 = vld [vmem:[#allocation29_spill] sm:$0xff] }
 0x357   : > { %1787 = vmatpush1.msra.mxu0 %v3723_v34 }
 0x358   : > { %v1644_v1 = vpop.permute.xlu0 %1643  ;;  %1788 = vmatprep.subr.mxu0 %v1670_v18  ;;  %v1680_v12 = vpop.permute.xlu1 %1679  ;;  %v4604_v18 = vld [vmem:[#allocation25_spill] sm:$0xff] }
 0x359   : > { %v1681_v45 = vsel %vm884_vm1, %v1678_v23, %v1680_v12  ;;  %v1684_v28 = vsel %vm884_vm1, %v1680_v12, %v1674_v21  ;;  %1789 = vmatpush1.msra.mxu0 %v1669_v24  ;;  %v4603_v24 = vld [vmem:[#allocation28_spill] sm:$0xff]  ;;  %vm4645_vm1 = vmmov %vm4643_vm0 }
 0x35a   : > { %v1687_v0 = vmul.f32 %v1681_v45, %v4599_v57  ;;  %v1688_v8 = vmul.f32 %v1684_v28, %v4600_v63  ;;  %1711 = vrot.lane.b32.xlu1 %v3729_v30, %s2521_s6 }
 0x35c   : > { %v1626_v27 = vpop.permute.xlu0 %1625  ;;  %1855 = vmatprep.subr.mxu1 %v1688_v8  ;;  %v1642_v34 = vpop.permute.xlu1 %1641 }
 0x35d   : > { %v1651_v42 = vsel %vm804_vm4, %v1642_v34, %v1644_v1  ;;  %1856 = vmatpush1.msra.mxu1 %v1687_v0 }
 0x35e   : > { %v1654_v23 = vmul.f32 %v1651_v42, %v4601_v60  ;;  %1857 = vmatprep.subr.mxu1 %v3729_v30  ;;  %v4607_v60 = vld [vmem:[#allocation32_spill] sm:$0xff] }
 0x35f   : > { %1858 = vmatpush1.msra.mxu1 %v3717_v52 }
 0x360   : > { %v1662_v21 = vpop.permute.xlu0 %1661  ;;  %1790 = vmatprep.subr.mxu0 %v1654_v23  ;;  %v1648_v46 = vpop.permute.xlu1 %1647 }
 0x361   : > { %v1665_v55 = vsel %vm844_vm3, %v1662_v21, %v1664_v47  ;;  %v1666_v53 = vsel %vm844_vm3, %v1660_v32, %v1662_v21  ;;  %v1652_v19 = vsel %vm804_vm4, %v1648_v46, %v1642_v34  ;;  %v4605_v47 = vld [vmem:[#allocation26_spill] sm:$0xff]  ;;  %v4606_v34 = vld [vmem:[#allocation33_spill] sm:$0xff]  ;;  %v4608_v21 = vld [vmem:[#allocation27_spill] sm:$0xff] }
 0x362   : > { %v1671_v38 = vmul.f32 %v1666_v53, %v4602_v26  ;;  %v1672_v31 = vmul.f32 %v1665_v55, %v4603_v24  ;;  %v1653_v30 = vmul.f32 %v1652_v19, %v4604_v18  ;;  %vm4652_vm3 = vmmov %vm4643_vm0 }
 0x364   : > { %v1610_v12 = vpop.permute.xlu0 %1609  ;;  %1791 = vmatpush1.msra.mxu0 %v1653_v30  ;;  %1859 = vmatprep.subr.mxu1 %v1672_v31  ;;  %v1628_v52 = vpop.permute.xlu1 %1627  ;;  %v4610_v30 = vld [vmem:[#allocation37_spill] sm:$0xff] }
 0x365   : > { %v1635_v45 = vsel %vm764_vm5, %v1626_v27, %v1628_v52  ;;  %1860 = vmatpush1.msra.mxu1 %v1671_v38 }
 0x366   : > { %v1638_v28 = vmul.f32 %v1635_v45, %v4605_v47  ;;  %v4611_v47 = vld [vmem:[#allocation36_spill] sm:$0xff] }
 0x368   : > { %v1646_v32 = vpop.permute.xlu0 %1645  ;;  %1792 = vmatprep.subr.mxu0 %v1638_v28  ;;  %v1632_v57 = vpop.permute.xlu1 %1631 }
 0x369   : > { %v1649_v0 = vsel %vm804_vm4, %v1646_v32, %v1648_v46  ;;  %v1650_v63 = vsel %vm804_vm4, %v1644_v1, %v1646_v32  ;;  %v1636_v8 = vsel %vm764_vm5, %v1632_v57, %v1626_v27  ;;  %v4609_v46 = vld [vmem:[#allocation30_spill] sm:$0xff]  ;;  %v4612_v32 = vld [vmem:[#allocation31_spill] sm:$0xff]  ;;  %vm4653_vm4 = vcmp.lt.s32.totalorder %v2833_v6, 73  ;;  %v2343_v6 = vld [vmem:[%s2699_s26] sm:$0xff] }
 0x36a   : > { %v1655_v42 = vmul.f32 %v1650_v63, %v4606_v34  ;;  %v1656_v23 = vmul.f32 %v1649_v0, %v4607_v60  ;;  %v1637_v55 = vmul.f32 %v1636_v8, %v4608_v21 }
 0x36c   : > { %v1594_v53 = vpop.permute.xlu0 %1593  ;;  %1793 = vmatpush1.msra.mxu0 %v1637_v55  ;;  %1861 = vmatprep.subr.mxu1 %v1656_v23  ;;  %v1612_v19 = vpop.permute.xlu1 %1611  ;;  %v4614_v55 = vld [vmem:[#allocation41_spill] sm:$0xff] }
 0x36d   : > { %v1619_v26 = vsel %vm724_vm6, %v1610_v12, %v1612_v19  ;;  %1862 = vmatpush1.msra.mxu1 %v1655_v42 }
 0x36e   : > { %v1622_v38 = vmul.f32 %v1619_v26, %v4609_v46  ;;  %v4615_v46 = vld [vmem:[#allocation40_spill] sm:$0xff] }
 0x370   : > { %v1630_v1 = vpop.permute.xlu0 %1629  ;;  %1794 = vmatprep.subr.mxu0 %v1622_v38  ;;  %v1616_v24 = vpop.permute.xlu1 %1615 }
 0x371   : > { %v1633_v27 = vsel %vm764_vm5, %v1630_v1, %v1632_v57  ;;  %v1634_v31 = vsel %vm764_vm5, %v1628_v52, %v1630_v1  ;;  %v1620_v18 = vsel %vm724_vm6, %v1616_v24, %v1610_v12  ;;  %v4613_v57 = vld [vmem:[#allocation34_spill] sm:$0xff]  ;;  %v4616_v1 = vld [vmem:[#allocation35_spill] sm:$0xff]  ;;  %vm4655_vm5 = vmmov %vm4653_vm4 }
 0x372   : > { %v1639_v45 = vmul.f32 %v1634_v31, %v4610_v30  ;;  %v1640_v28 = vmul.f32 %v1633_v27, %v4611_v47  ;;  %v1621_v0 = vmul.f32 %v1620_v18, %v4612_v32 }
 0x374   : > { %v1578_v63 = vpop.permute.xlu0 %1577  ;;  %1795 = vmatpush1.msra.mxu0 %v1621_v0  ;;  %1863 = vmatprep.subr.mxu1 %v1640_v28  ;;  %v1596_v8 = vpop.permute.xlu1 %1595  ;;  %v4618_v0 = vld [vmem:[#allocation45_spill] sm:$0xff] }
 0x375   : > { %v3939_v34 = vsel %vm684_vm7, %v1594_v53, %v1596_v8  ;;  %1864 = vmatpush1.msra.mxu1 %v1639_v45 }
 0x376   : > { %v1606_v52 = vmul.f32 %v3939_v34, %v4613_v57 }
 0x378   : > { %v1614_v42 = vpop.permute.xlu0 %1613  ;;  %1796 = vmatprep.subr.mxu0 %v1606_v52  ;;  %v1600_v12 = vpop.permute.xlu1 %1599  ;;  %v4619_v52 = vld [vmem:[#allocation44_spill] sm:$0xff] }
 0x379   : > { %v1617_v60 = vsel %vm724_vm6, %v1614_v42, %v1616_v24  ;;  %v1618_v23 = vsel %vm724_vm6, %v1612_v19, %v1614_v42  ;;  %v3949_v21 = vsel %vm684_vm7, %v1600_v12, %v1594_v53  ;;  %v4617_v19 = vld [vmem:[#allocation38_spill] sm:$0xff]  ;;  %vm4659_vm6 = vmmov %vm4653_vm4 }
 0x37a   : > { %v1623_v26 = vmul.f32 %v1618_v23, %v4614_v55  ;;  %v1624_v38 = vmul.f32 %v1617_v60, %v4615_v46  ;;  %v1605_v27 = vmul.f32 %v3949_v21, %v4616_v1  ;;  %v4620_v60 = vld [vmem:[#allocation39_spill] sm:$0xff] }
 0x37c   : > { %v1562_v31 = vpop.permute.xlu0 %1561  ;;  %1797 = vmatpush1.msra.mxu0 %v1605_v27  ;;  %1865 = vmatprep.subr.mxu1 %v1624_v38  ;;  %v1580_v18 = vpop.permute.xlu1 %1579 }
 0x37d   : > { %v3957_v24 = vsel %vm644_vm8, %v1578_v63, %v1580_v18  ;;  %1866 = vmatpush1.msra.mxu1 %v1623_v26 }
 0x37e   : > { %v1590_v53 = vmul.f32 %v3957_v24, %v4617_v19 }
 0x380   : > { %v1598_v30 = vpop.permute.xlu0 %1597  ;;  %1798 = vmatprep.subr.mxu0 %v1590_v53  ;;  %v1584_v45 = vpop.permute.xlu1 %1583  ;;  %v4622_v53 = vld [vmem:[#allocation49_spill] sm:$0xff] }
 0x381   : > { %v3963_v47 = vsel %vm684_vm7, %v1598_v30, %v1600_v12  ;;  %v3967_v28 = vsel %vm684_vm7, %v1596_v8, %v1598_v30  ;;  %v3971_v32 = vsel %vm644_vm8, %v1584_v45, %v1578_v63  ;;  %v4621_v63 = vld [vmem:[#allocation42_spill] sm:$0xff]  ;;  %vm4660_vm7 = vmmov %vm4653_vm4 }
 0x382   : > { %v1607_v57 = vmul.f32 %v3967_v28, %v4618_v0  ;;  %v1608_v42 = vmul.f32 %v3963_v47, %v4619_v52  ;;  %v1589_v23 = vmul.f32 %v3971_v32, %v4620_v60  ;;  %v4623_v0 = vld [vmem:[#allocation48_spill] sm:$0xff]  ;;  %v4624_v52 = vld [vmem:[#allocation43_spill] sm:$0xff] }
 0x384   : > { %v1546_v55 = vpop.permute.xlu0 %1545  ;;  %1867 = vmatprep.subr.mxu1 %v1608_v42  ;;  %v1564_v12 = vpop.permute.xlu1 %1563  ;;  %1799 = vmatpush1.msra.mxu0 %v1589_v23 }
 0x385   : > { %v3981_v8 = vsel %vm604_vm9, %v1562_v31, %v1564_v12  ;;  %1868 = vmatpush1.msra.mxu1 %v1607_v57 }
 0x386   : > { %v1574_v26 = vmul.f32 %v3981_v8, %v4621_v63 }
 0x388   : > { %v1582_v46 = vpop.permute.xlu0 %1581  ;;  %1800 = vmatprep.subr.mxu0 %v1574_v26  ;;  %v1568_v38 = vpop.permute.xlu1 %1567 }
 0x389   : > { %v3987_v1 = vsel %vm644_vm8, %v1582_v46, %v1584_v45  ;;  %v3991_v27 = vsel %vm644_vm8, %v1580_v18, %v1582_v46  ;;  %v3995_v19 = vsel %vm604_vm9, %v1568_v38, %v1562_v31  ;;  %v4625_v31 = vld [vmem:[#allocation46_spill] sm:$0xff]  ;;  %vm1963_vm8 = vcmask 64512  }
 0x38a   : > { %v1591_v30 = vmul.f32 %v3991_v27, %v4622_v53  ;;  %v1592_v57 = vmul.f32 %v3987_v1, %v4623_v0  ;;  %v1573_v42 = vmul.f32 %v3995_v19, %v4624_v52  ;;  %v4627_v52 = vld [vmem:[#allocation52_spill] sm:$0xff] }
 0x38c   : > { %v1530_v60 = vpop.permute.xlu0 %1529  ;;  %1869 = vmatprep.subr.mxu1 %v1592_v57  ;;  %v1548_v45 = vpop.permute.xlu1 %1547  ;;  %1801 = vmatpush1.msra.mxu0 %v1573_v42  ;;  %v4626_v57 = vld [vmem:[#allocation53_spill] sm:$0xff] }
 0x38d   : > { %v4005_v18 = vsel %vm564_vm10, %v1546_v55, %v1548_v45  ;;  %1870 = vmatpush1.msra.mxu1 %v1591_v30 }
 0x38e   : > { %v1558_v23 = vmul.f32 %v4005_v18, %v4625_v31  ;;  %v4628_v31 = vld [vmem:[#allocation47_spill] sm:$0xff] }
 0x390   : > { %v1566_v63 = vpop.permute.xlu0 %1565  ;;  %1802 = vmatprep.subr.mxu0 %v1558_v23  ;;  %v1552_v26 = vpop.permute.xlu1 %1551 }
 0x391   : > { %v4011_v46 = vsel %vm604_vm9, %v1566_v63, %v1568_v38  ;;  %v4015_v53 = vsel %vm604_vm9, %v1564_v12, %v1566_v63  ;;  %v4019_v0 = vsel %vm564_vm10, %v1552_v26, %v1546_v55  ;;  %v4629_v55 = vld [vmem:[#allocation50_spill] sm:$0xff] }
 0x392   : > { %v1575_v30 = vmul.f32 %v4015_v53, %v4626_v57  ;;  %v1576_v42 = vmul.f32 %v4011_v46, %v4627_v52  ;;  %v1557_v23 = vmul.f32 %v4019_v0, %v4628_v31 }
 0x394   : > { %v1514_v35 = vpop.permute.xlu0 %1513  ;;  %1871 = vmatprep.subr.mxu1 %v1576_v42  ;;  %v1532_v38 = vpop.permute.xlu1 %1531  ;;  %1803 = vmatpush1.msra.mxu0 %v1557_v23  ;;  %v4630_v23 = vld [vmem:[#allocation58_spill] sm:$0xff] }
 0x395   : > { %v4029_v12 = vsel %vm524_vm11, %v1530_v60, %v1532_v38  ;;  %1872 = vmatpush1.msra.mxu1 %v1575_v30 }
 0x396   : > { %v1542_v63 = vmul.f32 %v4029_v12, %v4629_v55 }
 0x398   : > { %v1550_v10 = vpop.permute.xlu0 %1549  ;;  %1804 = vmatprep.subr.mxu0 %v1542_v63  ;;  %v1536_v57 = vpop.permute.xlu1 %1535  ;;  %v4632_v63 = vld [vmem:[#allocation51_spill] sm:$0xff] }
 0x399   : > { %v4035_v52 = vsel %vm564_vm10, %v1550_v10, %v1552_v26  ;;  %v4039_v42 = vsel %vm564_vm10, %v1548_v45, %v1550_v10  ;;  %v4043_v31 = vsel %vm524_vm11, %v1536_v57, %v1530_v60  ;;  %v4633_v60 = vld [vmem:[#allocation55_spill] sm:$0xff] }
 0x39a   : > { %v1559_v30 = vmul.f32 %v4039_v42, %v4630_v23  ;;  %v1560_v55 = vmul.f32 %v4035_v52, %v4631_v58  ;;  %v1541_v15 = vmul.f32 %v4043_v31, %v4632_v63  ;;  %v4634_v63 = vld [vmem:[#allocation63_spill] sm:$0xff] }
 0x39c   : > { %v1498_v36 = vpop.permute.xlu0 %1497  ;;  %1873 = vmatprep.subr.mxu1 %v1560_v55  ;;  %v1516_v26 = vpop.permute.xlu1 %1515  ;;  %1805 = vmatpush1.msra.mxu0 %v1541_v15 }
 0x39d   : > { %v4053_v10 = vsel %vm484_vm12, %v1514_v35, %v1516_v26  ;;  %1874 = vmatpush1.msra.mxu1 %v1559_v30 }
 0x39e   : > { %v1526_v45 = vmul.f32 %v4053_v10, %v4633_v60 }
 0x3a0   : > { %v1534_v7 = vpop.permute.xlu0 %1533  ;;  %1806 = vmatprep.subr.mxu0 %v1526_v45  ;;  %v1520_v23 = vpop.permute.xlu1 %1519  ;;  %v4636_v45 = vld [vmem:[#allocation56_spill] sm:$0xff] }
 0x3a1   : > { %v4059_v58 = vsel %vm524_vm11, %v1534_v7, %v1536_v57  ;;  %v4063_v55 = vsel %vm524_vm11, %v1532_v38, %v1534_v7  ;;  %v4067_v15 = vsel %vm484_vm12, %v1520_v23, %v1514_v35  ;;  %v4637_v35 = vld [vmem:[#allocation61_spill] sm:$0xff] }
 0x3a2   : > { %v1543_v30 = vmul.f32 %v4063_v55, %v4634_v63  ;;  %v1544_v60 = vmul.f32 %v4059_v58, %v4635_v43  ;;  %v1525_v44 = vmul.f32 %v4067_v15, %v4636_v45  ;;  %v4640_v45 = vld [vmem:[#allocation70_spill] sm:$0xff] }
 0x3a4   : > { %v1482_v3 = vpop.permute.xlu0 %1481  ;;  %1875 = vmatprep.subr.mxu1 %v1544_v60  ;;  %v1500_v57 = vpop.permute.xlu1 %1499  ;;  %1807 = vmatpush1.msra.mxu0 %v1525_v44 }
 0x3a5   : > { %v4077_v7 = vsel %vm444_vm13, %v1498_v36, %v1500_v57  ;;  %1876 = vmatpush1.msra.mxu1 %v1543_v30 }
 0x3a6   : > { %v1510_v38 = vmul.f32 %v4077_v7, %v4637_v35 }
 0x3a8   : > { %v1518_v5 = vpop.permute.xlu0 %1517  ;;  %1808 = vmatprep.subr.mxu0 %v1510_v38  ;;  %v1504_v63 = vpop.permute.xlu1 %1503  ;;  %v4642_v38 = vld [vmem:[#allocation65_spill] sm:$0xff] }
 0x3a9   : > { %v4083_v43 = vsel %vm484_vm12, %v1518_v5, %v1520_v23  ;;  %v4087_v60 = vsel %vm484_vm12, %v1516_v26, %v1518_v5  ;;  %v4091_v44 = vsel %vm444_vm13, %v1504_v63, %v1498_v36  ;;  %v4644_v36 = vld [vmem:[#allocation68_spill] sm:$0xff] }
 0x3aa   : > { %4638 = vst [vmem:[#allocation84_spill] sm:$0xff] %v4083_v43  ;;  %4639 = vst [vmem:[#allocation60_spill] sm:$0xff] %v4091_v44  ;;  %v1527_v30 = vmul.f32 %v4087_v60, %v4640_v45  ;;  %v1528_v35 = vmul.f32 %v4083_v43, %v4641_v2  ;;  %v1509_v20 = vmul.f32 %v4091_v44, %v4642_v38  ;;  %v4647_v38 = vld [vmem:[#allocation81_spill] sm:$0xff]  ;;  %v4648_v44 = vld [vmem:[#allocation80_spill] sm:$0xff] }
 0x3ac   : > { %v1466_v22 = vpop.permute.xlu0 %1465  ;;  %1877 = vmatprep.subr.mxu1 %v1528_v35  ;;  %v1484_v23 = vpop.permute.xlu1 %1483  ;;  %1809 = vmatpush1.msra.mxu0 %v1509_v20 }
 0x3ad   : > { %v4101_v5 = vsel %vm4643_vm0, %v1482_v3, %v1484_v23  ;;  %1878 = vmatpush1.msra.mxu1 %v1527_v30 }
 0x3ae   : > { %v1494_v26 = vmul.f32 %v4101_v5, %v4644_v36 }
 0x3b0   : > { %v1502_v51 = vpop.permute.xlu0 %1501  ;;  %1810 = vmatprep.subr.mxu0 %v1494_v26  ;;  %v1488_v45 = vpop.permute.xlu1 %1487  ;;  %v4649_v26 = vld [vmem:[#allocation72_spill] sm:$0xff] }
 0x3b1   : > { %v4107_v2 = vsel %vm444_vm13, %v1502_v51, %v1504_v63  ;;  %v4111_v35 = vsel %vm444_vm13, %v1500_v57, %v1502_v51  ;;  %v4115_v20 = vsel %vm4645_vm1, %v1488_v45, %v1482_v3 }
 0x3b2   : > { %4646 = vst [vmem:[#allocation66_spill] sm:$0xff] %v4115_v20  ;;  %v1511_v30 = vmul.f32 %v4111_v35, %v4647_v38  ;;  %v1512_v36 = vmul.f32 %v4107_v2, %v4648_v44  ;;  %v1493_v4 = vmul.f32 %v4115_v20, %v4649_v26 }
 0x3b4   : > { %v1486_v43 = vpop.permute.xlu0 %1485  ;;  %1879 = vmatprep.subr.mxu1 %v1512_v36  ;;  %v1468_v63 = vpop.permute.xlu1 %1467  ;;  %1811 = vmatpush1.msra.mxu0 %v1493_v4  ;;  %v4654_v36 = vld [vmem:[#allocation76_spill] sm:$0xff] }
 0x3b5   : > { %v4125_v51 = vsel %vm4650_vm2, %v1486_v43, %v1488_v45  ;;  %v4129_v3 = vsel %vm4652_vm3, %v1484_v23, %v1486_v43  ;;  %v4133_v57 = vsel %vm4653_vm4, %v1466_v22, %v1468_v63  ;;  %1880 = vmatpush1.msra.mxu1 %v1511_v30  ;;  %v4656_v23 = vld [vmem:[#allocation82_spill] sm:$0xff] }
 0x3b6   : > { %4651 = vst [vmem:[#allocation69_spill] sm:$0xff] %v4125_v51  ;;  %v1495_v44 = vmul.f32 %v4129_v3, %v3479_v25  ;;  %v1496_v38 = vmul.f32 %v4125_v51, %v3483_v59  ;;  %v1478_v45 = vmul.f32 %v4133_v57, %v4654_v36  ;;  %v4657_v25 = vld [vmem:[#allocation77_spill] sm:$0xff]  ;;  %v1766_v36 = vmul.f32 %v3991_v27, %v3396_v29 }
 0x3b7   : > { %v1770_v20 = vmul.f32 %v3967_v28, %v4657_v25  ;;  %v4658_v59 = vld [vmem:[#allocation73_spill] sm:$0xff]  ;;  %v1762_v29 = vmul.f32 %v4015_v53, %v3424_v56  ;;  %v1772_v27 = vmul.f32 %v3949_v21, %v3356_v50  ;;  %v1768_v50 = vmul.f32 %v3971_v32, %v3373_v40  ;;  %v4663_v32 = vld [vmem:[#allocation83_spill] sm:$0xff]  ;;  %v4666_v53 = vld [vmem:[#allocation90_spill] sm:$0xff] }
 0x3b8   : > { %1881 = vmatprep.subr.mxu1 %v1496_v38  ;;  %v1472_v26 = vpop.permute.xlu1 %1471  ;;  %1812 = vmatprep.subr.mxu0 %v1478_v45  ;;  %v4145_v43 = vpop.permute.xlu0 %1723  ;;  %v1769_v51 = vmul.f32 %v3939_v34, %v4658_v59  ;;  %v1765_v45 = vmul.f32 %v3957_v24, %v3353_v9  ;;  %v1758_v24 = vmul.f32 %v4039_v42, %v3450_v54 }
 0x3b9   : > { %v4143_v4 = vsel %vm4655_vm5, %v1472_v26, %v1466_v22  ;;  %1882 = vmatpush1.msra.mxu1 %v1495_v44  ;;  %v1767_v56 = vmul.f32 %v3987_v1, %v3402_v39  ;;  %v1754_v21 = vmul.f32 %v4063_v55, %v3456_v17  ;;  %v1753_v54 = vmul.f32 %v4029_v12, %v3412_v14  ;;  %v4662_v17 = vld [vmem:[#allocation79_spill] sm:$0xff]  ;;  %v4664_v1 = vld [vmem:[#allocation96_spill] sm:$0xff] }
 0x3ba   : > { %v1477_v30 = vmul.f32 %v4143_v4, %v4656_v23  ;;  %v4661_v23 = vld [vmem:[#allocation93_spill] sm:$0xff]  ;;  %v1750_v39 = vmul.f32 %v4087_v60, %v3496_v62  ;;  %v1759_v14 = vmul.f32 %v4035_v52, %v4564_v11  ;;  %v1756_v62 = vmul.f32 %v4043_v31, %v4569_v48  ;;  %v4667_v12 = vld [vmem:[#allocation99_spill] sm:$0xff] }
 0x3bb   : > { %v1742_v11 = vmul.f32 %v4129_v3, %v4667_v12  ;;  %v4668_v52 = vld [vmem:[#allocation85_spill] sm:$0xff]  ;;  %v4674_v3 = vld [vmem:[#allocation95_spill] sm:$0xff] }
 0x3bc   : > { %1813 = vmatpush1.msra.mxu0 %v1477_v30  ;;  %v1470_v38 = vpop.permute.xlu1 %1469  ;;  %v1752_v42 = vmul.f32 %v4067_v15, %v4668_v52  ;;  %v4671_v60 = vld [vmem:[#allocation101_spill] sm:$0xff] }
 0x3bd   : > { %v4157_v22 = vsel %vm4659_vm6, %v1470_v38, %v1472_v26  ;;  %v1474_v44 = vsel %vm4660_vm7, %v1468_v63, %v1470_v38  ;;  %1824 = vmatprep.subr.mxu0 %v1770_v20  ;;  %v1761_v63 = vmul.f32 %v3981_v8, %v3390_v49  ;;  %v4172_v20 = vpop.permute.xlu0 %1721  ;;  %v1757_v49 = vmul.f32 %v4005_v18, %v3399_v33 }
 0x3be   : > { %v1479_v28 = vmul.f32 %v1474_v44, %v3519_v61  ;;  %v1480_v34 = vmul.f32 %v4157_v22, %v4661_v23  ;;  %1825 = vmatpush2.msra.mxu0 %v1769_v51  ;;  %v1771_v61 = vmul.f32 %v3963_v47, %v3393_v41  ;;  %v1764_v41 = vmul.f32 %v3995_v19, %v3405_v13  ;;  %v4665_v19 = vld [vmem:[#allocation86_spill] sm:$0xff] }
 0x3bf   : > { %1826 = vmatprep.subr.mxu0 %v1766_v36  ;;  %v1763_v33 = vmul.f32 %v4011_v46, %v3427_v16  ;;  %v1760_v47 = vmul.f32 %v4019_v0, %v4662_v17  ;;  %v1749_v13 = vmul.f32 %v4053_v10, %v4663_v32  ;;  %v1746_v16 = vmul.f32 %v4111_v35, %v4664_v1  ;;  %v4669_v10 = vld [vmem:[#allocation92_spill] sm:$0xff]  ;;  %v4687_v17 = vld [vmem:[#allocation59_spill] sm:$0xff]  ;;  %v4688_v32 = vld [vmem:[#allocation62_spill] sm:$0xff] }
 0x3c0   : > { %1827 = vmatpush2.msra.mxu0 %v1765_v45  ;;  %1883 = vmatprep.subr.mxu1 %v1480_v34  ;;  %v4174_v9 = vpop.permute.xlu1 %1725  ;;  %v1745_v18 = vmul.f32 %v4077_v7, %v4665_v19  ;;  %v1755_v0 = vmul.f32 %v4059_v58, %v4666_v53  ;;  %v1741_v48 = vmul.f32 %v4101_v5, %v4669_v10  ;;  %v4670_v58 = vld [vmem:[#allocation84_spill] sm:$0xff]  ;;  %v4672_v5 = vld [vmem:[#allocation91_spill] sm:$0xff]  ;;  %v4678_v45 = vld [vmem:[#allocation66_spill] sm:$0xff] }
 0x3c1   : > { %1828 = vmatprep.subr.mxu0 %v1762_v29  ;;  %1884 = vmatpush1.msra.mxu1 %v1479_v28  ;;  %v1710_v8 = vpop.permute.xlu0 %1709  ;;  %v1730_v31 = vsel %vm1004_vm15, %v4145_v43, %v4174_v9  ;;  %v1751_v55 = vmul.f32 %v4670_v58, %v3499_v37  ;;  %v1731_v7 = vsel %vm1004_vm15, %v4172_v20, %v4145_v43  ;;  %v4673_v35 = vld [vmem:[#allocation60_spill] sm:$0xff]  ;;  %v4675_v37 = vld [vmem:[#allocation97_spill] sm:$0xff]  ;;  %v4676_v43 = vld [vmem:[#allocation103_spill] sm:$0xff] }
 0x3c2   : > { %1829 = vmatpush2.msra.mxu0 %v1761_v63  ;;  %1895 = vmatprep.subr.mxu1 %v1772_v27  ;;  %v1738_v15 = vmul.f32 %v1474_v44, %v4671_v60  ;;  %v1748_v51 = vmul.f32 %v4673_v35, %v4672_v5  ;;  %v1737_v26 = vmul.f32 %v4133_v57, %v4674_v3  ;;  %v4677_v44 = vld [vmem:[#allocation94_spill] sm:$0xff]  ;;  %v4679_v57 = vld [vmem:[#allocation104_spill] sm:$0xff]  ;;  %v4681_v27 = vld [vmem:[#allocation69_spill] sm:$0xff] }
 0x3c3   : > { %1830 = vmatprep.subr.mxu0 %v1758_v24  ;;  %1896 = vmatpush2.msra.mxu1 %v1771_v61  ;;  %v1747_v59 = vmul.f32 %v4107_v2, %v4675_v37  ;;  %v1734_v38 = vmul.f32 %v1730_v31, %v4676_v43  ;;  %v1744_v28 = vmul.f32 %v4678_v45, %v4677_v44  ;;  %v4680_v29 = vld [vmem:[#allocation100_spill] sm:$0xff]  ;;  %v4682_v61 = vld [vmem:[#allocation105_spill] sm:$0xff]  ;;  %v4689_v1 = vld [vmem:[#allocation54_spill] sm:$0xff] }
 0x3c4   : > { %1831 = vmatpush2.msra.mxu0 %v1757_v49  ;;  %1897 = vmatprep.subr.mxu1 %v1768_v50  ;;  %v1708_v40 = vpop.permute.xlu1 %1707  ;;  %v1733_v23 = vmul.f32 %v1731_v7, %v4679_v57  ;;  %v1743_v63 = vmul.f32 %v4681_v27, %v4680_v29  ;;  %v4683_v50 = vld [vmem:[#allocation98_spill] sm:$0xff]  ;;  %v2345_v19 = vld [vmem:[%s2699_s26 + $0x10] sm:$0xff]  ;;  %v1957_v3 = vld [vmem:[%s4331_s7] sm:$0xff] }
 0x3c5   : > { %1832 = vmatprep.subr.mxu0 %v1754_v21  ;;  %1898 = vmatpush2.msra.mxu1 %v1767_v56  ;;  %v1728_v30 = vpop.permute.xlu0 %1727  ;;  %v1714_v25 = vsel %vm964_vm14, %v1708_v40, %v1710_v8  ;;  %v1740_v49 = vmul.f32 %v4143_v4, %v4683_v50  ;;  %v4684_v21 = vld [vmem:[#allocation106_spill] sm:$0xff]  ;;  %v4686_v4 = vld [vmem:[#allocation87_spill] sm:$0xff] }
 0x3c6   : > { %1833 = vmatpush2.msra.mxu0 %v1753_v54  ;;  %1899 = vmatprep.subr.mxu1 %v1764_v41  ;;  %v1732_v2 = vsel %vm1004_vm15, %v1728_v30, %v4172_v20  ;;  %v1718_v24 = vmul.f32 %v1714_v25, %v4682_v61  ;;  %v1729_v56 = vsel %vm1004_vm15, %v4174_v9, %v1728_v30  ;;  %v1463_v20 = vld [vmem:[%s4328_s4] sm:$0xff]  ;;  %v4685_v54 = vld [vmem:[#allocation102_spill] sm:$0xff] }
 0x3c7   : > { %1834 = vmatprep.subr.mxu0 %v1750_v39  ;;  %1900 = vmatpush2.msra.mxu1 %v1763_v33  ;;  %v1736_v9 = vmul.f32 %v1732_v2, %v4686_v4 }
 0x3c8   : > { %1835 = vmatpush2.msra.mxu0 %v1749_v13  ;;  %1901 = vmatprep.subr.mxu1 %v1760_v47  ;;  %v1706_v46 = vpop.permute.xlu1 %1705  ;;  %v1735_v47 = vmul.f32 %v1729_v56, %v4687_v17 }
 0x3c9   : > { %1836 = vmatprep.subr.mxu0 %v1746_v16  ;;  %1902 = vmatpush2.msra.mxu1 %v1759_v14  ;;  %v1715_v36 = vsel %vm964_vm14, %v1706_v46, %v1708_v40  ;;  %v1739_v40 = vmul.f32 %v4157_v22, %v4685_v54  ;;  %v2342_v22 = vld [vmem:[%s2699_s26 + $0x8] sm:$0xff]  ;;  %v1956_v14 = vld [vmem:[#allocation7] sm:$0xff] }
 0x3ca   : > { %1837 = vmatpush2.msra.mxu0 %v1745_v18  ;;  %1903 = vmatprep.subr.mxu1 %v1756_v62  ;;  %v1717_v41 = vmul.f32 %v1715_v36, %v4684_v21  ;;  %v2344_v62 = vld [vmem:[%s2699_s26 + $0x18] sm:$0xff] }
 0x3cb   : > { %1838 = vmatprep.subr.mxu0 %v1742_v11  ;;  %1904 = vmatpush2.msra.mxu1 %v1755_v0 }
 0x3cc   : > { %1839 = vmatpush2.msra.mxu0 %v1741_v48  ;;  %1905 = vmatprep.subr.mxu1 %v1752_v42  ;;  %v1712_v34 = vpop.permute.xlu1 %1711 }
 0x3cd   : > { %1840 = vmatprep.subr.mxu0 %v1738_v15  ;;  %1906 = vmatpush2.msra.mxu1 %v1751_v55  ;;  %v1716_v33 = vsel %vm964_vm14, %v1712_v34, %v1706_v46  ;;  %v1713_v39 = vsel %vm964_vm14, %v1710_v8, %v1712_v34  ;;  %v2523_v8 = vmov 0.0  }
 0x3ce   : > { %1841 = vmatpush2.msra.mxu0 %v1737_v26  ;;  %1907 = vmatprep.subr.mxu1 %v1748_v51  ;;  %v1720_v13 = vmul.f32 %v1716_v33, %v4688_v32  ;;  %v1719_v16 = vmul.f32 %v1713_v39, %v4689_v1 }
 0x3cf   : > { %1842 = vmatprep.subr.mxu0 %v1734_v38  ;;  %1908 = vmatpush2.msra.mxu1 %v1747_v59 }
 0x3d0   : > { %1843 = vmatpush2.msra.mxu0 %v1733_v23  ;;  %1909 = vmatprep.subr.mxu1 %v1744_v28 }
 0x3d1   : > { %1844 = vmatprep.subr.mxu0 %v1718_v24  ;;  %1910 = vmatpush2.msra.mxu1 %v1743_v63  ;;  %v1777_v18 = vpop.permute.xlu0 %1776 }
 0x3d2   : > { %1845 = vmatpush2.msra.mxu0 %v1717_v41  ;;  %1911 = vmatprep.subr.mxu1 %v1740_v49 }
 0x3d3   : > { %1847 = vmatmul.mubr.f32.vlgmr.msra.gmra.mxu0 %v1463_v20  ;;  %1912 = vmatpush2.msra.mxu1 %v1739_v40 }
 0x3d4   : > { %1913 = vmatprep.subr.mxu1 %v1736_v9  ;;  %1997 = vmatprep.subr.mxu0 %v2342_v22 }
 0x3d5   : > { %1914 = vmatpush2.msra.mxu1 %v1735_v47  ;;  %1998 = vmatpush1.msra.mxu0 %v2343_v6 }
 0x3d6   : > { %1915 = vmatprep.subr.mxu1 %v1720_v13  ;;  %2031 = vmatprep.mubr.f32.mxu0 %v2523_v8 }
 0x3d7   : > { %1916 = vmatpush2.msra.mxu1 %v1719_v16  ;;  %2240 = vmatmul.mubr.msk.f32.vlgmr.msra.gmra.mxu0 %vm1963_vm8, %v1956_v14 }
 0x3d8   : > { %1918 = vmatmul.mubr.f32.vlgmr.msra.gmra.mxu1 %v1463_v20  ;;  %2068 = vmatprep.subr.mxu1 %v2344_v62 }
 0x3d9   : > { %2069 = vmatpush1.msra.mxu1 %v2345_v19  ;;  %2102 = vmatprep.mubr.f32.mxu1 %v2523_v8 }
 0x3dc   : > { %2241 = vmatmul.mubr.msk.f32.vlgmr.msra.gmra.mxu1 %vm1963_vm8, %v1956_v14 }
 0x493   : > { %v1848_v46 = vpop.f32.mrf.mxu0 }
 0x494   : > { %v1849_v53 = vadd.f32 %v1848_v46, %v1777_v18 }
 0x495   : > { %v1850_v0 = vpop.f32.mrf.mxu0 }
 0x496   : > { %v1851_v12 = vadd.f32 %v1850_v0, %v1777_v18  ;;  %v1930_v11 = vmul.f32 %v1849_v53, %v1849_v53 }
 0x497   : > { %v2033_v36 = vpop.f32.mrf.mxu0 }
 0x498   : > { %v1924_v52 = vadd.f32 %v1851_v12, %v1849_v53  ;;  %v1931_v42 = vmul.f32 %v1851_v12, %v1851_v12  ;;  %v1919_v10 = vpop.f32.mrf.mxu1 }
 0x499   : > { %v1920_v48 = vadd.f32 %v1919_v10, %v1777_v18  ;;  %v2035_v45 = vpop.f32.mrf.mxu0 }
 0x49a   : > { %v1934_v31 = vadd.f32 %v1931_v42, %v1930_v11  ;;  %v1921_v58 = vpop.f32.mrf.mxu1 }
 0x49b   : > { %v1925_v55 = vadd.f32 %v1924_v52, %v1920_v48  ;;  %v1932_v7 = vmul.f32 %v1920_v48, %v1920_v48  ;;  %v1922_v60 = vadd.f32 %v1921_v58, %v1777_v18 }
 0x49c   : > { %v2104_v44 = vpop.f32.mrf.mxu1 }
 0x49d   : > { %v1933_v15 = vmul.f32 %v1922_v60, %v1922_v60  ;;  %v1926_v5 = vadd.f32 %v1925_v55, %v1922_v60  ;;  %v1935_v35 = vadd.f32 %v1934_v31, %v1932_v7 }
 0x49e   : > { %v2106_v28 = vpop.f32.mrf.mxu1 }
 0x49f   : > { %1927 = vadd.xlane.f32.xlu1 %v1926_v5  ;;  %v1936_v51 = vadd.f32 %v1935_v35, %v1933_v15 }
 0x4a1   : > { %1937 = vadd.xlane.f32.xlu0 %v1936_v51 }
 0x4b7   : > { %1960 = vperm.xlu0 %2337, %v1957_v3  }
 0x528   : > { %v1928_v26 = vpop.xlane.xlu1 %1927 }
 0x529   : > { %v1929_v30 = vmul.f32 0.001953125, %v1928_v26 }
 0x52a   : > { %v1938_v25 = vpop.xlane.xlu0 %1937 }
 0x52b   : > { %v1939_v37 = vmul.f32 0.001953125, %v1938_v25  ;;  %v1940_v59 = vmul.f32 %v1929_v30, %v1929_v30  ;;  %v1942_v23 = vsub.f32 %v1849_v53, %v1929_v30  ;;  %v1943_v34 = vsub.f32 %v1851_v12, %v1929_v30 }
 0x52c   : > { %v1944_v29 = vsub.f32 %v1920_v48, %v1929_v30  ;;  %v1945_v27 = vsub.f32 %v1922_v60, %v1929_v30 }
 0x52d   : > { %v1941_v43 = vsub.f32 %v1939_v37, %v1940_v59 }
 0x52f   : > { %v1946_v38 = vadd.f32 1e-05, %v1941_v43 }
 0x531   : > { %2340 = vrsqrt.f32 %v1946_v38 }
 0x532   : > { %v1961_v57 = vpop.permute.xlu0 %1960 }
 0x533   : > { %v2034_v49 = vadd.f32 %v2033_v36, %v1961_v57  ;;  %v2036_v56 = vadd.f32 %v2035_v45, %v1961_v57  ;;  %v2105_v21 = vadd.f32 %v2104_v44, %v1961_v57  ;;  %v2107_v41 = vadd.f32 %v2106_v28, %v1961_v57 }
 0x53e   : > { %v2341_v63 = vpop.eup %2340 }
 0x53f   : > { %v1948_v2 = vmul.f32 %v2341_v63, %v1942_v23  ;;  %v1949_v61 = vmul.f32 %v2341_v63, %v1943_v34  ;;  %v1950_v24 = vmul.f32 %v2341_v63, %v1944_v29  ;;  %v1951_v50 = vmul.f32 %v2341_v63, %v1945_v27 }
 0x541   : > { %v1952_v20 = vmax.f32 %v1948_v2, 0.0  ;;  %v1953_v54 = vmax.f32 %v1949_v61, 0.0  ;;  %v1954_v40 = vmax.f32 %v1950_v24, 0.0  ;;  %v1955_v33 = vmax.f32 %v1951_v50, 0.0 }
 0x543   : > { %v2109_v4 = vadd.f32 %v2034_v49, %v1952_v20  ;;  %v2110_v9 = vadd.f32 %v2036_v56, %v1953_v54  ;;  %v2111_v39 = vadd.f32 %v2105_v21, %v1954_v40  ;;  %v2112_v17 = vadd.f32 %v2107_v41, %v1955_v33 }
 0x545   : > { %2113 = vst [vmem:[%s348_s24] sm:$0xff] %v2109_v4  ;;  %2114 = vst [vmem:[%s348_s24 + $0x8] sm:$0xff] %v2110_v9 }
 0x546   : > { %2115 = vst [vmem:[%s348_s24 + $0x10] sm:$0xff] %v2111_v39  ;;  %2116 = vst [vmem:[%s348_s24 + $0x18] sm:$0xff] %v2112_v17 }
 0x547   : > { %2439 = shalt.err (!%p2436_p7)
}
 0x548   : > { %s2440_s17 = scalar_lea.hbm %s4280_s14, 512  ;;  %s2444_s26 = scalar_lea.hbm %s4332_s8, 1024 }
 0x549   : > { %p2441_p10 = scmp.ne.s32.totalorder %s4280_s14, %s2440_s17  ;;  %p2445_p8 = scmp.lt.s32.totalorder %s4280_s14, %s4332_s8 }
 0x54a   : > { %p2446_p11 = scmp.lt.s32.totalorder %s2444_s26, %s2440_s17 }
 0x54b   : > { %p2442_p13 = pnand %p2441_p10, %p4691_p2 }
 0x54c   : > { %p2447_p0 = por %p2446_p11, %p2445_p8 }
 0x54d   : > { %p2443_p5 = pneg %p2442_p13 }
 0x54f   : > { %p2448_p1 = pnand %p2447_p0, %p2443_p5 }
 0x551   : > { %2451 = shalt.err (!%p2448_p1)
}
 0x552   : > { %2259 = dma.vmem_to_hbm [thread:$0]  (%p4691_p2), %s4282_s13, 512, %s4280_s14, %s2118_s19  }
 0x553 PF: > { %s2144_s24 = sand.u32 1, %s2486_s27   ;;  %p4692_p4 = scmp.ne.s32.totalorder %s4454_s12, 0 }
 0x554   : > { %p4693_p6 = scmp.ge.s32.totalorder %s2498_s30, 2  ;;  %s2145_s11 = scalar_lea.sflag [#allocation4], %s2144_s24 }
 0x556   : > { %p2273_p9 = pnand %p4693_p6, %p4692_p4 }
 0x558   : > { %p2274_p12 = pneg %p2273_p9 }
 0x55a   : > { %2481 = dma.done.wait (%p2274_p12), %s2145_s11, 512  }
 0x55b   : > { %2483 = vsyncadd (%p2274_p12), %s2145_s11, 4294966784  ;;  %s4694_s15 = sld [smem:[#allocation13_spill]]  ;;  %p22_p3 = scmp.ge.s32.totalorder %s2642_s10, 4  }
 0x55c   : > { %s4695_s27 = smov %s2490_s28  ;;  %s4696_s28 = smov %s2494_s29 }
 0x55d   : > { %s4698_s30 = smov %s2642_s10  ;;  %24 = sbr.rel (!%p22_p3) target bundleno = 9 (0x9), region = 131 }
 0x561   : > { %s4697_s29 = smov %s4694_s15 }
 0x562   :  { %2150 = vsyncpa [#allocation3], 1 }
 0x563   :  { %2152 = vsyncpa [#allocation3 + $0x1], 1 }
 0x564   :  { %2153 = vsyncpa [#allocation6], 1 }
 0x565   :  { %2155 = vsyncpa [#allocation6 + $0x1], 1 }
 0x566   :  { %2156 = vsyncpa [#allocation4], 1 }
 0x567   :  { %2158 = vsyncpa [#allocation4 + $0x1], 1 }

</bundles_post_ra>
